<compile_context>
chip_gen: v7x
topology: tpu7x:2x2x1
jax: 0.10.0
libtpu: 0.0.40
codegen_flags: <defaults>
</compile_context>

<pallas_src>
import functools

import jax
import jax.numpy as jnp
from jax import lax
from jax.experimental import pallas as pl
from jax.experimental.pallas import tpu as pltpu

BN_EPS = 1e-5
K1, K2, K3 = 255, 127, 63        # InceptionConv2d kernel widths (fixed in the module)
POOL1_W, POOL2_W = 4, 8          # AdaptiveAvgPool2d target widths


def _bn_scale_shift(gamma, beta, mean, var):
    scale = gamma / jnp.sqrt(var + BN_EPS)
    return scale, beta - mean * scale


# -----------------------------------------------------------------------------------
# Fused kernel, grid = (ceil(B/Bt),).  Weight slabs have constant block indices and
# are single-buffered; per-step working set is ~3 MiB << 32 MiB scoped VMEM.
# -----------------------------------------------------------------------------------
def _p4_fused_kernel(x_ref, t_ref, w2_ref, bz_ref, p1_ref, w4_ref, b3_ref,
                     fcw_ref, s_ref, fcb_ref, o_ref, pool_ref,
                     *, Bt, nc, nt, F1, D, F2, x_dtype):
    f32 = jnp.float32

    def elu(v):
        # eval-mode ELU; clamp the untaken branch so exp() never overflows
        return jnp.where(v > 0, v, jnp.exp(jnp.minimum(v, 0.0)) - 1.0)

    # (Bt, nc, nt) -> (Bt*nc, nt); cast once to the Toeplitz dtype (bf16) for the MXU.
    xb = x_ref[...].reshape(Bt * nc, nt).astype(x_dtype)

    rows = Bt * D

    def per_filter(g, carry):
        # Inception conv0 (3 kernels pre-folded) as one shifted-Toeplitz MXU matmul:
        # (Bt*nc, nt) @ (nt, nt) -> raw conv output of filter g for all Bt samples.
        y = jnp.dot(xb, t_ref[g], preferred_element_type=f32)
        # Grouped conv2 with conv0-bias + BN0 + BN2 folded in (block-diagonal over
        # the batch tile), then ELU.  All elementwise math stays float32.
        z = jnp.dot(w2_ref[g], y, preferred_element_type=f32) + bz_ref[g]
        z = elu(z)
        # pool1 (AdaptiveAvgPool2d((1,4))) as a matmul; write the (Bt*D, 4) slab
        # straight into the pooled scratch so no (F1*Bt*nc, nt) intermediate or
        # concatenate ever materialises.
        pg = jnp.dot(z, p1_ref[...], preferred_element_type=f32)
        r0 = pl.multiple_of(g * rows, rows)
        pool_ref[pl.ds(r0, rows), :] = pg
        return carry

    lax.fori_loop(0, F1, per_filter, 0)

    pooled = pool_ref[...]                                    # (F1*Bt*D, 4), rows (g,b,d)

    # conv4 (1x1) with BN3 folded in (block-diagonal over the batch tile), then ELU.
    zz = jnp.dot(w4_ref[...], pooled, preferred_element_type=f32) + b3_ref[...]
    zz = elu(zz)                                              # (Bt*F2, 4), rows (b,q)

    # fc with pool2's 4->8 duplication folded in.  The (q, w) contraction is done as
    # POOL1_W broadcast-FMAs over the (static) pooled-width index plus one per-sample
    # row-sum matmul, avoiding any sublane<->lane reshape/transpose.
    v = zz[:, 0:1] * fcw_ref[0]
    for w in range(1, POOL1_W):
        v = v + zz[:, w:w + 1] * fcw_ref[w]                   # (Bt*F2, CP)
    logits = jnp.dot(s_ref[...], v, preferred_element_type=f32) + fcb_ref[...]
    o_ref[...] = logits.astype(o_ref.dtype)                   # lane-dense (Bt, 128) store


# -----------------------------------------------------------------------------------
# One-time parameter preparation (hoisted out of the jitted per-call path).
# -----------------------------------------------------------------------------------
def prepare_params(params, *, nc, nt, F1=8, F2=16, D=2, classes=10,
                   batch_tile=8, toeplitz_dtype=jnp.bfloat16):
    f32 = jnp.float32
    Bt = batch_tile

    # Fold the three inception kernels (same input, summed outputs, centre-aligned).
    wc = params['incep_w1'].astype(f32)
    wc = wc.at[:, (K1 - K2) // 2:(K1 - K2) // 2 + K2].add(params['incep_w2'])
    wc = wc.at[:, (K1 - K3) // 2:(K1 - K3) // 2 + K3].add(params['incep_w3'])
    bias0 = params['incep_b1'] + params['incep_b2'] + params['incep_b3']
    scale0, shift0 = _bn_scale_shift(params['bn0_gamma'], params['bn0_beta'],
                                     params['bn0_mean'], params['bn0_var'])

    # Shifted Toeplitz expansion: T[f, j, t] = wc[f, j - t + K1//2] (zero outside the
    # kernel support).  'same' zero-padding is folded into the matrix, so x needs no
    # time padding.  Stored in bf16 (MXU-native); f32 accumulation in the kernel.
    pad = K1 // 2
    k = jnp.arange(nt)[:, None] - jnp.arange(nt)[None, :] + pad        # (nt, nt)
    valid = (k >= 0) & (k < K1)
    T = jnp.where(valid[None], wc[:, jnp.clip(k, 0, K1 - 1)], 0.0)
    T = T.astype(toeplitz_dtype)                                       # (F1, nt, nt)

    # conv2 (grouped (nc,1) conv) with conv0-bias + BN0 + BN2 folded in, expanded to a
    # block-diagonal-over-the-batch-tile matmul (rows ordered (b, d) per filter).
    s2, shift2 = _bn_scale_shift(params['bn2_gamma'], params['bn2_beta'],
                                 params['bn2_mean'], params['bn2_var'])
    sh0tot = bias0 * scale0 + shift0
    w2 = params['conv2_w'].astype(f32)                                 # (F1*D, nc)
    group_of = jnp.arange(F1 * D) // D
    W2eff = (s2 * scale0[group_of])[:, None] * w2                      # (F1*D, nc)
    eyeB = jnp.eye(Bt, dtype=f32)
    W2blk = jnp.stack([jnp.kron(eyeB, W2eff[g * D:(g + 1) * D]) for g in range(F1)])
    Bfold = s2 * sh0tot[group_of] * w2.sum(axis=1) + shift2            # (F1*D,)
    Bfold_t = jnp.stack([jnp.tile(Bfold[g * D:(g + 1) * D], Bt)
                         for g in range(F1)])[..., None]               # (F1, Bt*D, 1)

    # AdaptiveAvgPool2d((1, 4)) averaging matrix.
    blen = nt // POOL1_W
    P1 = ((jnp.arange(nt)[:, None] // blen) ==
          jnp.arange(POOL1_W)[None, :]).astype(f32) / blen             # (nt, 4)

    # conv4 (1x1) with BN3 folded, expanded to a block-diag-over-batch-tile matmul.
    s3, shift3 = _bn_scale_shift(params['bn3_gamma'], params['bn3_beta'],
                                 params['bn3_mean'], params['bn3_var'])
    W4fold = s3[:, None] * params['conv4_w'].astype(f32)               # (F2, F1*D)
    W4r = W4fold.reshape(F2, F1, D)
    W4big = jnp.einsum('qgd,bc->bqgcd', W4r, eyeB).reshape(Bt * F2, F1 * Bt * D)
    shift3big = jnp.tile(shift3, Bt)[:, None].astype(f32)              # (Bt*F2, 1)

    # fc with pool2's 4->8 duplication folded in.  Stored as (w, (b,q), class) slabs
    # for the in-kernel broadcast-FMA formulation plus a per-sample row-sum matrix S.
    CP = ((classes + 127) // 128) * 128
    fcw3 = params['fc_w'].reshape(classes, F2, POOL2_W)
    fc_eff = fcw3[:, :, 0::2] + fcw3[:, :, 1::2]                       # (cls, F2, 4)
    fc_eff_p = jnp.pad(fc_eff, ((0, CP - classes), (0, 0), (0, 0)))    # (CP, F2, 4)
    FCw = jnp.transpose(fc_eff_p, (2, 1, 0))                           # (4, F2, CP)
    FCw_tiled = jnp.tile(FCw, (1, Bt, 1)).astype(f32)                  # (4, Bt*F2, CP)
    S = jnp.kron(eyeB, jnp.ones((1, F2), f32))                         # (Bt, Bt*F2)
    fcb = jnp.pad(params['fc_b'], (0, CP - classes)).reshape(1, CP).astype(f32)

    return dict(T=T, W2blk=W2blk.astype(f32), Bfold=Bfold_t.astype(f32), P1=P1,
                W4big=W4big.astype(f32), shift3=shift3big, fc_w=FCw_tiled, S=S,
                fcb=fcb)


def p4_forward(x, prepped, *, F1=8, F2=16, D=2, classes=10, batch_tile=8):
    """Pallas forward pass of P4. Returns (logits, None) like the PyTorch module."""
    B, cin, nc, nt = x.shape
    assert cin == 1
    assert nt % 32 == 0 and nt // 32 == POOL2_W, (
        "the module's fc layer is only shape-consistent when nt // 32 == 8")
    assert nt % POOL1_W == 0 and nt % 128 == 0

    Bt = batch_tile
    assert Bt % 8 == 0, "batch tile must be a multiple of 8 for the (Bt, 128) store"
    assert prepped['W2blk'].shape == (F1, Bt * D, Bt * nc), (
        "prepare_params() was built for a different batch_tile")

    # re1 -> adctconv -> re2:
    # TODO(synk): WTConv2d is not defined in the provided source; the rearrange ->
    # WTConv2d(nc) -> rearrange block is treated as the identity mapping here.

    T = prepped['T']
    CP = prepped['fcb'].shape[-1]

    xs = x[:, 0]                                        # (B, nc, nt) -- no time padding
    B_pad = ((B + Bt - 1) // Bt) * Bt
    if B_pad != B:
        xs = jnp.pad(xs, ((0, B_pad - B), (0, 0), (0, 0)))

    kernel = functools.partial(_p4_fused_kernel, Bt=Bt, nc=nc, nt=nt, F1=F1, D=D,
                               F2=F2, x_dtype=T.dtype)

    def wspec2(shape):
        return pl.BlockSpec(shape, lambda i: (0, 0), pipeline_mode=pl.Buffered(1))

    def wspec3(shape):
        return pl.BlockSpec(shape, lambda i: (0, 0, 0), pipeline_mode=pl.Buffered(1))

    out = pl.pallas_call(
        kernel,
        out_shape=jax.ShapeDtypeStruct((B_pad, CP), jnp.float32),
        grid=(B_pad // Bt,),
        in_specs=[
            pl.BlockSpec((Bt, nc, nt), lambda i: (i, 0, 0)),   # x tile (double-buffered)
            wspec3((F1, nt, nt)),                              # Toeplitz slab (bf16)
            wspec3((F1, Bt * D, Bt * nc)),                     # conv2 block-diag
            wspec3((F1, Bt * D, 1)),                           # folded conv2/BN bias
            wspec2((nt, POOL1_W)),                             # pool1 averaging matrix
            wspec2((Bt * F2, F1 * Bt * D)),                    # conv4 block-diag
            wspec2((Bt * F2, 1)),                              # folded BN3 shift
            wspec3((POOL1_W, Bt * F2, CP)),                    # fc slabs (per pooled w)
            wspec2((Bt, Bt * F2)),                             # per-sample row-sum matrix
            wspec2((1, CP)),                                   # fc bias
        ],
        out_specs=pl.BlockSpec((Bt, CP), lambda i: (i, 0)),
        scratch_shapes=[pltpu.VMEM((F1 * Bt * D, POOL1_W), jnp.float32)],
        compiler_params=pltpu.CompilerParams(
            dimension_semantics=("parallel",),
            vmem_limit_bytes=32 * 1024 * 1024),
    )(xs, T, prepped['W2blk'], prepped['Bfold'], prepped['P1'],
      prepped['W4big'], prepped['shift3'], prepped['fc_w'], prepped['S'],
      prepped['fcb'])

    return out[:B, :classes], None


# -------------------------- pure-JAX reference (for checking) ------------------------
def reference_forward(x, params, *, F1=8, F2=16, D=2, classes=10):
    B, _, nc, nt = x.shape

    def conv_w(xin, w, b, k):
        w4d = w.reshape(w.shape[0], 1, 1, k)
        y = lax.conv_general_dilated(xin, w4d, (1, 1),
                                     [(0, 0), (k // 2, k // 2)],
                                     dimension_numbers=('NCHW', 'OIHW', 'NCHW'))
        return y + b[None, :, None, None]

    def bn(t, g, bta, m, v):
        sc = g / jnp.sqrt(v + BN_EPS)
        return t * sc[None, :, None, None] + (bta - m * sc)[None, :, None, None]

    y = (conv_w(x, params['incep_w1'], params['incep_b1'], K1)
         + conv_w(x, params['incep_w2'], params['incep_b2'], K2)
         + conv_w(x, params['incep_w3'], params['incep_b3'], K3))
    y = bn(y, params['bn0_gamma'], params['bn0_beta'], params['bn0_mean'], params['bn0_var'])
    # re1 -> WTConv2d (identity) -> re2 == identity
    w2 = params['conv2_w'].reshape(F1 * D, 1, nc, 1)
    y = lax.conv_general_dilated(y, w2, (1, 1), 'VALID',
                                 dimension_numbers=('NCHW', 'OIHW', 'NCHW'),
                                 feature_group_count=F1)               # (B, F1*D, 1, nt)
    y = bn(y, params['bn2_gamma'], params['bn2_beta'], params['bn2_mean'], params['bn2_var'])
    y = jnp.where(y > 0, y, jnp.exp(y) - 1.0)
    y = y.reshape(B, F1 * D, 1, POOL1_W, nt // POOL1_W).mean(axis=-1)  # pool1
    y = jnp.einsum('oi,bihw->bohw', params['conv4_w'], y)              # conv4 (1x1)
    y = bn(y, params['bn3_gamma'], params['bn3_beta'], params['bn3_mean'], params['bn3_var'])
    y = jnp.where(y > 0, y, jnp.exp(y) - 1.0)
    y = jnp.repeat(y, POOL2_W // POOL1_W, axis=-1)                     # pool2 (4 -> 8)
    flat = y.reshape(B, -1)
    logits = flat @ params['fc_w'].T + params['fc_b'][None, :]
    return logits, None


# -------------------------- deterministic parameter init -----------------------------
def init_params(key, *, F1, F2, D, nc, nt, classes):
    ks = iter(jax.random.split(key, 32))

    def nrm(shape, scale=0.05):
        return scale * jax.random.normal(next(ks), shape, jnp.float32)

    def uni(shape, lo, hi):
        return jax.random.uniform(next(ks), shape, jnp.float32, lo, hi)

    return dict(
        incep_w1=nrm((F1, K1)), incep_b1=nrm((F1,), 0.1),
        incep_w2=nrm((F1, K2)), incep_b2=nrm((F1,), 0.1),
        incep_w3=nrm((F1, K3)), incep_b3=nrm((F1,), 0.1),
        bn0_gamma=uni((F1,), 0.8, 1.2), bn0_beta=nrm((F1,), 0.1),
        bn0_mean=nrm((F1,), 0.1), bn0_var=uni((F1,), 0.5, 1.5),
        conv2_w=nrm((F1 * D, nc), 0.1),
        bn2_gamma=uni((F1 * D,), 0.8, 1.2), bn2_beta=nrm((F1 * D,), 0.1),
        bn2_mean=nrm((F1 * D,), 0.1), bn2_var=uni((F1 * D,), 0.5, 1.5),
        conv4_w=nrm((F2, F1 * D), 0.2),
        bn3_gamma=uni((F2,), 0.8, 1.2), bn3_beta=nrm((F2,), 0.1),
        bn3_mean=nrm((F2,), 0.1), bn3_var=uni((F2,), 0.5, 1.5),
        fc_w=nrm((classes, F2 * (nt // 32)), 0.1),
        fc_b=nrm((classes,), 0.1),
    )


if __name__ == "__main__":
    # Small shapes consistent with the module (nt=256 keeps the fc layer consistent).
    B, nc, nt = 16, 16, 256
    F1, F2, D, classes = 8, 16, 2, 10
    Bt = 8                                     # batch tile (use 16 on v6e/v7x)

    key = jax.random.PRNGKey(0)
    kx, kp = jax.random.split(key)
    x = jax.random.normal(kx, (B, 1, nc, nt), jnp.float32)
    params = init_params(kp, F1=F1, F2=F2, D=D, nc=nc, nt=nt, classes=classes)

    # One-time parameter prep (Toeplitz expansion, BN/bias/pool folding, batch-tile
    # block-diagonal expansion) -- hoisted out of the jitted per-call path.
    prepped = prepare_params(params, nc=nc, nt=nt, F1=F1, F2=F2, D=D,
                             classes=classes, batch_tile=Bt)
    prepped = jax.tree_util.tree_map(jax.block_until_ready, prepped)

    fwd = jax.jit(functools.partial(p4_forward, F1=F1, F2=F2, D=D,
                                    classes=classes, batch_tile=Bt))
    logits, aux = fwd(x, prepped)
    logits = jax.block_until_ready(logits)

    assert logits.shape == (B, classes)
    ref, _ = reference_forward(x, params, F1=F1, F2=F2, D=D, classes=classes)
    err = float(jnp.max(jnp.abs(logits - ref)))
    # 5e-3 budget: the Toeplitz slab / x tile are intentionally bf16 on the MXU
    # (f32 accumulation); everything else is exact f32 folding.
    assert err < 5e-3, f"mismatch vs reference: {err}"
    print("KERNEL_OK")
</pallas_src>

<mosaic_0001>
module attributes {stable_mosaic.version = 11 : i64} {
  func.func @_p4_fused_kernel(%arg0: i32, %arg1: memref<8x16x256xf32, #tpu.memory_space<vmem>>, %arg2: memref<8x256x256xbf16, #tpu.memory_space<vmem>>, %arg3: memref<8x16x128xf32, #tpu.memory_space<vmem>>, %arg4: memref<8x16x1xf32, #tpu.memory_space<vmem>>, %arg5: memref<256x4xf32, #tpu.memory_space<vmem>>, %arg6: memref<128x128xf32, #tpu.memory_space<vmem>>, %arg7: memref<128x1xf32, #tpu.memory_space<vmem>>, %arg8: memref<4x128x128xf32, #tpu.memory_space<vmem>>, %arg9: memref<8x128xf32, #tpu.memory_space<vmem>>, %arg10: memref<1x128xf32, #tpu.memory_space<vmem>>, %arg11: memref<8x128xf32, #tpu.memory_space<vmem>>, %arg12: memref<128x4xf32, #tpu.memory_space<vmem>>) attributes {dimension_semantics = [#tpu.dimension_semantics<parallel>], iteration_bounds = array<i64: 2>, scalar_prefetch = 0 : i64, scratch_operands = 1 : i64, tpu.core_type = #tpu.core_type<tc>, window_params = [{transform_indices = @transform_0, window_bounds = array<i64: 8, 16, 256>}, {pipeline_mode = #tpu.pipeline_mode<synchronous>, transform_indices = @transform_1, window_bounds = array<i64: 8, 256, 256>}, {pipeline_mode = #tpu.pipeline_mode<synchronous>, transform_indices = @transform_2, window_bounds = array<i64: 8, 16, 128>}, {pipeline_mode = #tpu.pipeline_mode<synchronous>, transform_indices = @transform_3, window_bounds = array<i64: 8, 16, 1>}, {pipeline_mode = #tpu.pipeline_mode<synchronous>, transform_indices = @transform_4, window_bounds = array<i64: 256, 4>}, {pipeline_mode = #tpu.pipeline_mode<synchronous>, transform_indices = @transform_5, window_bounds = array<i64: 128, 128>}, {pipeline_mode = #tpu.pipeline_mode<synchronous>, transform_indices = @transform_6, window_bounds = array<i64: 128, 1>}, {pipeline_mode = #tpu.pipeline_mode<synchronous>, transform_indices = @transform_7, window_bounds = array<i64: 4, 128, 128>}, {pipeline_mode = #tpu.pipeline_mode<synchronous>, transform_indices = @transform_8, window_bounds = array<i64: 8, 128>}, {pipeline_mode = #tpu.pipeline_mode<synchronous>, transform_indices = @transform_9, window_bounds = array<i64: 1, 128>}, {transform_indices = @transform_10, window_bounds = array<i64: 8, 128>}]} {
    %c0 = arith.constant 0 : index
    %c0_0 = arith.constant 0 : index
    %c0_1 = arith.constant 0 : index
    %0 = vector.load %arg1[%c0, %c0_0, %c0_1] : memref<8x16x256xf32, #tpu.memory_space<vmem>>, vector<8x16x256xf32>
    %1 = vector.shape_cast %0 : vector<8x16x256xf32> to vector<128x256xf32>
    %2 = arith.truncf %1 : vector<128x256xf32> to vector<128x256xbf16>
    %c0_i32 = arith.constant 0 : i32
    %c8_i32 = arith.constant 8 : i32
    %3 = arith.addi %c0_i32, %c8_i32 : i32
    %c1_i32 = arith.constant 1 : i32
    scf.for %arg13 = %c0_i32 to %3 step %c1_i32  : i32 {
      %47 = arith.index_cast %arg13 : i32 to index
      %c0_28 = arith.constant 0 : index
      %c0_29 = arith.constant 0 : index
      %48 = vector.load %arg2[%47, %c0_28, %c0_29] : memref<8x256x256xbf16, #tpu.memory_space<vmem>>, vector<1x256x256xbf16>
      %49 = vector.shape_cast %48 : vector<1x256x256xbf16> to vector<256x256xbf16>
      %cst_30 = arith.constant dense<0.000000e+00> : vector<128x256xf32>
      %50 = tpu.matmul %2, %49, %cst_30 {dimension_numbers = #tpu.dot_dimension_numbers<[1], [0], [0], [1], [0, 0, 1, 1], [], []>} : vector<128x256xbf16>, vector<256x256xbf16>, vector<128x256xf32> -> vector<128x256xf32>
      %51 = arith.index_cast %arg13 : i32 to index
      %c0_31 = arith.constant 0 : index
      %c0_32 = arith.constant 0 : index
      %52 = vector.load %arg3[%51, %c0_31, %c0_32] : memref<8x16x128xf32, #tpu.memory_space<vmem>>, vector<1x16x128xf32>
      %53 = vector.shape_cast %52 : vector<1x16x128xf32> to vector<16x128xf32>
      %cst_33 = arith.constant dense<0.000000e+00> : vector<16x256xf32>
      %54 = tpu.matmul %53, %50, %cst_33 {dimension_numbers = #tpu.dot_dimension_numbers<[1], [0], [0], [1], [0, 0, 1, 1], [], []>} : vector<16x128xf32>, vector<128x256xf32>, vector<16x256xf32> -> vector<16x256xf32>
      %55 = arith.index_cast %arg13 : i32 to index
      %c0_34 = arith.constant 0 : index
      %c0_35 = arith.constant 0 : index
      %56 = vector.load %arg4[%55, %c0_34, %c0_35] : memref<8x16x1xf32, #tpu.memory_space<vmem>>, vector<1x16x1xf32>
      %57 = vector.shape_cast %56 : vector<1x16x1xf32> to vector<16x1xf32>
      %58 = vector.broadcast %57 : vector<16x1xf32> to vector<16x256xf32>
      %59 = arith.addf %54, %58 : vector<16x256xf32>
      %cst_36 = arith.constant 0.000000e+00 : f32
      %60 = vector.broadcast %cst_36 : f32 to vector<16x256xf32>
      %61 = arith.cmpf ogt, %59, %60 : vector<16x256xf32>
      %cst_37 = arith.constant 0.000000e+00 : f32
      %62 = vector.broadcast %cst_37 : f32 to vector<16x256xf32>
      %63 = arith.minimumf %59, %62 : vector<16x256xf32>
      %64 = math.exp %63 : vector<16x256xf32>
      %cst_38 = arith.constant 1.000000e+00 : f32
      %65 = vector.broadcast %cst_38 : f32 to vector<16x256xf32>
      %66 = arith.subf %64, %65 : vector<16x256xf32>
      %67 = arith.select %61, %59, %66 : vector<16x256xi1>, vector<16x256xf32>
      %c0_39 = arith.constant 0 : index
      %c0_40 = arith.constant 0 : index
      %68 = vector.load %arg5[%c0_39, %c0_40] : memref<256x4xf32, #tpu.memory_space<vmem>>, vector<256x4xf32>
      %cst_41 = arith.constant dense<0.000000e+00> : vector<16x4xf32>
      %69 = tpu.matmul %67, %68, %cst_41 {dimension_numbers = #tpu.dot_dimension_numbers<[1], [0], [0], [1], [0, 0, 1, 1], [], []>} : vector<16x256xf32>, vector<256x4xf32>, vector<16x4xf32> -> vector<16x4xf32>
      %c16_i32 = arith.constant 16 : i32
      %70 = arith.muli %arg13, %c16_i32 : i32
      %71 = tpu.assume_multiple %70, 16 : i32
      %72 = arith.index_cast %71 : i32 to index
      %c0_42 = arith.constant 0 : index
      %73 = vector.load %arg12[%72, %c0_42] : memref<128x4xf32, #tpu.memory_space<vmem>>, vector<16x4xf32>
      tpu.vector_store %arg12[%72, %c0_42], %69 {strides = array<i32>} : memref<128x4xf32, #tpu.memory_space<vmem>>, vector<16x4xf32>,
    }
    %c8_i32_2 = arith.constant 8 : i32
    %c0_3 = arith.constant 0 : index
    %c0_4 = arith.constant 0 : index
    %4 = vector.load %arg12[%c0_3, %c0_4] : memref<128x4xf32, #tpu.memory_space<vmem>>, vector<128x4xf32>
    %c0_5 = arith.constant 0 : index
    %c0_6 = arith.constant 0 : index
    %5 = vector.load %arg6[%c0_5, %c0_6] : memref<128x128xf32, #tpu.memory_space<vmem>>, vector<128x128xf32>
    %cst = arith.constant dense<0.000000e+00> : vector<128x4xf32>
    %6 = tpu.matmul %5, %4, %cst {dimension_numbers = #tpu.dot_dimension_numbers<[1], [0], [0], [1], [0, 0, 1, 1], [], []>} : vector<128x128xf32>, vector<128x4xf32>, vector<128x4xf32> -> vector<128x4xf32>
    %c0_7 = arith.constant 0 : index
    %c0_8 = arith.constant 0 : index
    %7 = vector.load %arg7[%c0_7, %c0_8] : memref<128x1xf32, #tpu.memory_space<vmem>>, vector<128x1xf32>
    %8 = vector.broadcast %7 : vector<128x1xf32> to vector<128x4xf32>
    %9 = arith.addf %6, %8 : vector<128x4xf32>
    %cst_9 = arith.constant 0.000000e+00 : f32
    %10 = vector.broadcast %cst_9 : f32 to vector<128x4xf32>
    %11 = arith.cmpf ogt, %9, %10 : vector<128x4xf32>
    %cst_10 = arith.constant 0.000000e+00 : f32
    %12 = vector.broadcast %cst_10 : f32 to vector<128x4xf32>
    %13 = arith.minimumf %9, %12 : vector<128x4xf32>
    %14 = math.exp %13 : vector<128x4xf32>
    %cst_11 = arith.constant 1.000000e+00 : f32
    %15 = vector.broadcast %cst_11 : f32 to vector<128x4xf32>
    %16 = arith.subf %14, %15 : vector<128x4xf32>
    %17 = arith.select %11, %9, %16 : vector<128x4xi1>, vector<128x4xf32>
    %18 = vector.extract_strided_slice %17 {offsets = [0, 0], sizes = [128, 1], strides = [1, 1]} : vector<128x4xf32> to vector<128x1xf32>
    %c0_12 = arith.constant 0 : index
    %c0_13 = arith.constant 0 : index
    %c0_14 = arith.constant 0 : index
    %19 = vector.load %arg8[%c0_12, %c0_13, %c0_14] : memref<4x128x128xf32, #tpu.memory_space<vmem>>, vector<1x128x128xf32>
    %20 = vector.shape_cast %19 : vector<1x128x128xf32> to vector<128x128xf32>
    %21 = vector.broadcast %18 : vector<128x1xf32> to vector<128x128xf32>
    %22 = arith.mulf %21, %20 : vector<128x128xf32>
    %23 = vector.extract_strided_slice %17 {offsets = [0, 1], sizes = [128, 1], strides = [1, 1]} : vector<128x4xf32> to vector<128x1xf32>
    %c1 = arith.constant 1 : index
    %c0_15 = arith.constant 0 : index
    %c0_16 = arith.constant 0 : index
    %24 = vector.load %arg8[%c1, %c0_15, %c0_16] : memref<4x128x128xf32, #tpu.memory_space<vmem>>, vector<1x128x128xf32>
    %25 = vector.shape_cast %24 : vector<1x128x128xf32> to vector<128x128xf32>
    %26 = vector.broadcast %23 : vector<128x1xf32> to vector<128x128xf32>
    %27 = arith.mulf %26, %25 : vector<128x128xf32>
    %28 = arith.addf %22, %27 : vector<128x128xf32>
    %29 = vector.extract_strided_slice %17 {offsets = [0, 2], sizes = [128, 1], strides = [1, 1]} : vector<128x4xf32> to vector<128x1xf32>
    %c2 = arith.constant 2 : index
    %c0_17 = arith.constant 0 : index
    %c0_18 = arith.constant 0 : index
    %30 = vector.load %arg8[%c2, %c0_17, %c0_18] : memref<4x128x128xf32, #tpu.memory_space<vmem>>, vector<1x128x128xf32>
    %31 = vector.shape_cast %30 : vector<1x128x128xf32> to vector<128x128xf32>
    %32 = vector.broadcast %29 : vector<128x1xf32> to vector<128x128xf32>
    %33 = arith.mulf %32, %31 : vector<128x128xf32>
    %34 = arith.addf %28, %33 : vector<128x128xf32>
    %35 = vector.extract_strided_slice %17 {offsets = [0, 3], sizes = [128, 1], strides = [1, 1]} : vector<128x4xf32> to vector<128x1xf32>
    %c3 = arith.constant 3 : index
    %c0_19 = arith.constant 0 : index
    %c0_20 = arith.constant 0 : index
    %36 = vector.load %arg8[%c3, %c0_19, %c0_20] : memref<4x128x128xf32, #tpu.memory_space<vmem>>, vector<1x128x128xf32>
    %37 = vector.shape_cast %36 : vector<1x128x128xf32> to vector<128x128xf32>
    %38 = vector.broadcast %35 : vector<128x1xf32> to vector<128x128xf32>
    %39 = arith.mulf %38, %37 : vector<128x128xf32>
    %40 = arith.addf %34, %39 : vector<128x128xf32>
    %c0_21 = arith.constant 0 : index
    %c0_22 = arith.constant 0 : index
    %41 = vector.load %arg9[%c0_21, %c0_22] : memref<8x128xf32, #tpu.memory_space<vmem>>, vector<8x128xf32>
    %cst_23 = arith.constant dense<0.000000e+00> : vector<8x128xf32>
    %42 = tpu.matmul %41, %40, %cst_23 {dimension_numbers = #tpu.dot_dimension_numbers<[1], [0], [0], [1], [0, 0, 1, 1], [], []>} : vector<8x128xf32>, vector<128x128xf32>, vector<8x128xf32> -> vector<8x128xf32>
    %c0_24 = arith.constant 0 : index
    %c0_25 = arith.constant 0 : index
    %43 = vector.load %arg10[%c0_24, %c0_25] : memref<1x128xf32, #tpu.memory_space<vmem>>, vector<1x128xf32>
    %44 = vector.broadcast %43 : vector<1x128xf32> to vector<8x128xf32>
    %45 = arith.addf %42, %44 : vector<8x128xf32>
    %c0_26 = arith.constant 0 : index
    %c0_27 = arith.constant 0 : index
    %46 = vector.load %arg11[%c0_26, %c0_27] : memref<8x128xf32, #tpu.memory_space<vmem>>, vector<8x128xf32>
    tpu.vector_store %arg11[%c0_26, %c0_27], %45 {strides = array<i32>} : memref<8x128xf32, #tpu.memory_space<vmem>>, vector<8x128xf32>,
    return
  }
  func.func @transform_0(%arg0: i32) -> (i32, i32, i32) {
    %c0_i32 = arith.constant 0 : i32
    %c0_i32_0 = arith.constant 0 : i32
    %c0_i32_1 = arith.constant 0 : i32
    return %arg0, %c0_i32, %c0_i32_0 : i32, i32, i32
  }
  func.func @transform_1(%arg0: i32) -> (i32, i32, i32) {
    %c0_i32 = arith.constant 0 : i32
    %c0_i32_0 = arith.constant 0 : i32
    %c0_i32_1 = arith.constant 0 : i32
    %c0_i32_2 = arith.constant 0 : i32
    return %c0_i32, %c0_i32_0, %c0_i32_1 : i32, i32, i32
  }
  func.func @transform_2(%arg0: i32) -> (i32, i32, i32) {
    %c0_i32 = arith.constant 0 : i32
    %c0_i32_0 = arith.constant 0 : i32
    %c0_i32_1 = arith.constant 0 : i32
    %c0_i32_2 = arith.constant 0 : i32
    return %c0_i32, %c0_i32_0, %c0_i32_1 : i32, i32, i32
  }
  func.func @transform_3(%arg0: i32) -> (i32, i32, i32) {
    %c0_i32 = arith.constant 0 : i32
    %c0_i32_0 = arith.constant 0 : i32
    %c0_i32_1 = arith.constant 0 : i32
    %c0_i32_2 = arith.constant 0 : i32
    return %c0_i32, %c0_i32_0, %c0_i32_1 : i32, i32, i32
  }
  func.func @transform_4(%arg0: i32) -> (i32, i32) {
    %c0_i32 = arith.constant 0 : i32
    %c0_i32_0 = arith.constant 0 : i32
    %c0_i32_1 = arith.constant 0 : i32
    return %c0_i32, %c0_i32_0 : i32, i32
  }
  func.func @transform_5(%arg0: i32) -> (i32, i32) {
    %c0_i32 = arith.constant 0 : i32
    %c0_i32_0 = arith.constant 0 : i32
    %c0_i32_1 = arith.constant 0 : i32
    return %c0_i32, %c0_i32_0 : i32, i32
  }
  func.func @transform_6(%arg0: i32) -> (i32, i32) {
    %c0_i32 = arith.constant 0 : i32
    %c0_i32_0 = arith.constant 0 : i32
    %c0_i32_1 = arith.constant 0 : i32
    return %c0_i32, %c0_i32_0 : i32, i32
  }
  func.func @transform_7(%arg0: i32) -> (i32, i32, i32) {
    %c0_i32 = arith.constant 0 : i32
    %c0_i32_0 = arith.constant 0 : i32
    %c0_i32_1 = arith.constant 0 : i32
    %c0_i32_2 = arith.constant 0 : i32
    return %c0_i32, %c0_i32_0, %c0_i32_1 : i32, i32, i32
  }
  func.func @transform_8(%arg0: i32) -> (i32, i32) {
    %c0_i32 = arith.constant 0 : i32
    %c0_i32_0 = arith.constant 0 : i32
    %c0_i32_1 = arith.constant 0 : i32
    return %c0_i32, %c0_i32_0 : i32, i32
  }
  func.func @transform_9(%arg0: i32) -> (i32, i32) {
    %c0_i32 = arith.constant 0 : i32
    %c0_i32_0 = arith.constant 0 : i32
    %c0_i32_1 = arith.constant 0 : i32
    return %c0_i32, %c0_i32_0 : i32, i32
  }
  func.func @transform_10(%arg0: i32) -> (i32, i32) {
    %c0_i32 = arith.constant 0 : i32
    %c0_i32_0 = arith.constant 0 : i32
    return %arg0, %c0_i32 : i32, i32
  }
}

</mosaic_0001>

<bundles_post_ra>
// kernel: p4_forward.1
= control target key start
LH: loop header
LB: loop body
LE: loop exit
PB: predicated region body
PF: predicated region fallthrough
CT: control target
= control target key end

     0   :  { %15 = vsyncpa [#allocation4], 0  ;;  %s3727_s0 = inlined_call_operand.vmem [shape: f32[16,16,256], index: 0, kind: input, shape index: {}]   ;;  %s3728_s1 = inlined_call_operand.hbm [shape: bf16[8,256,256], index: 1, kind: input, shape index: {}]   ;;  %s3729_s2 = inlined_call_operand.hbm [shape: f32[8,16,128], index: 2, kind: input, shape index: {}]   ;;  %s3730_s3 = inlined_call_operand.vmem [shape: f32[8,16,1], index: 3, kind: input, shape index: {}]   ;;  %s3731_s4 = inlined_call_operand.vmem [shape: f32[256,4], index: 4, kind: input, shape index: {}]   ;;  %s3732_s5 = inlined_call_operand.hbm [shape: f32[128,128], index: 5, kind: input, shape index: {}]   ;;  %s3733_s6 = inlined_call_operand.vmem [shape: f32[128,1], index: 6, kind: input, shape index: {}]   ;;  %s3734_s7 = inlined_call_operand.hbm [shape: f32[4,128,128], index: 7, kind: input, shape index: {}]   ;;  %s3735_s8 = inlined_call_operand.vmem [shape: f32[8,128], index: 8, kind: input, shape index: {}]   ;;  %s3736_s9 = inlined_call_operand.vmem [shape: f32[1,128], index: 9, kind: input, shape index: {}]   ;;  %s3737_s10 = inlined_call_operand.hbm [shape: f32[16,128], index: 10, kind: output, shape index: {}]  }
   0x1   :  { %16 = vsyncpa [#allocation7], 0 }
   0x2   :  { %17 = vsyncpa [#allocation10], 0 }
   0x3   :  { %18 = vsyncpa [#allocation5], 0 }
   0x4   :  { %20 = vsyncpa [#allocation5 + $0x1], 0  ;;  %s2930_s13 = smov 0   ;;  %s2932_s14 = smov 0  }
   0x5   :  { %s2934_s15 = smov 0   ;;  %s2936_s16 = smov 0  }
   0x6 LB: > { %3747 = sst [smem:[#allocation16_spill]] %s2841_s13  ;;  %s2951_s17 = sadd.s32 4294967295, %s2853_s16   ;;  %s2853_s16 = sphi %s2936_s16, %s3774_s16   ;;  %s2849_s15 = sphi %s2934_s15, %s3776_s15   ;;  %s2845_s14 = sphi %s2932_s14, %s3778_s14   ;;  %s2841_s13 = sphi %s2930_s13, %s3777_s13  }
   0x7   : > { %3748 = sst [smem:[#allocation17_spill]] %s2849_s15  ;;  %s2039_s18 = sadd.s32 4294967294, %s2853_s16  }
   0x8   : > { %3749 = sst [smem:[#allocation18_spill]] %s2853_s16  ;;  %s2955_s19 = sadd.s32 1, %s2853_s16  }
   0x9   : > { %3750 = sst [smem:[#allocation19_spill]] %s2955_s19  ;;  %s248_s20 = sadd.s32 1, %s2849_s15 }
   0xa   : > { %s245_s21 = ssub.s32 %s2853_s16, %s2955_s19  ;;  %p258_p0 = scmp.ne.s32.totalorder %s2849_s15, %s2845_s14 }
   0xb   : > { %p246_p1 = scmp.eq.s32.totalorder %s245_s21, 0  ;;  %p259_p2 = scmp.eq.s32.totalorder %s2951_s17, 1 }
   0xc   : > { %p264_p3 = scmp.ne.s32.totalorder %s2845_s14, %s2841_s13  ;;  %p265_p4 = scmp.eq.s32.totalorder %s2039_s18, 1 }
   0xd   : > { %s2966_s22 = scalar_select %p246_p1, %s2849_s15, %s248_s20  }
   0xe   : > { %p2968_p5 = por %p259_p2, %p258_p0  ;;  %p2972_p6 = por %p265_p4, %p264_p3 }
   0xf   : > { %3751 = sst [smem:[#allocation20_spill]] %s2966_s22  ;;  %p2040_p7 = scmp.ge.s32.totalorder %s2853_s16, 1 }
  0x10   : > { %s3752_s23 = scalar_select %p2968_p5, 1, 0 }
  0x11   : > { %s3753_s24 = scalar_select %p2972_p6, 1, 0 }
  0x12   : > { %p272_p8 = scmp.lt.s32.totalorder %s2853_s16, 3  ;;  %p3739_p9 = scmp.eq.s32.totalorder %s2951_s17, 0 }
  0x13   : > { %3754 = sst [smem:[#allocation21_spill]] %s3753_s24  ;;  %s2859_s26 = smov [#allocation6]  }
  0x14   : > { %p2979_p10 = pnand %p2040_p7, %p272_p8  ;;  %s297_s27 = sshll.u32 %s2859_s26, 4  ;;  %s2985_s27 = int_to_ptr.vmem [resolvable:$true] %s297_s27 }
  0x15   : > { %s2860_s29 = smov [#allocation3]   ;;  %s2861_s11 = smov [#allocation8]  }
  0x16   : > { %s3755_s25 = scalar_select %p2979_p10, 1, 0 }
  0x17   : > { %p2433_p11 = pneg %p2979_p10  ;;  %s284_s30 = sshll.u32 %s2860_s29, 4  ;;  %s2993_s30 = int_to_ptr.vmem [resolvable:$true] %s284_s30 }
  0x18   : > { %s2995_s12 = sshll.u32 %s2861_s11, 4  ;;  %s2663_s21 = scalar_lea.hbm %s3729_s2, 2048  ;;  %s317_s12 = int_to_ptr.vmem [resolvable:$true] %s2995_s12 }
  0x19   : > { %p2989_p12 = pnand %p3739_p9, %p2433_p11  ;;  %p2664_p13 = scmp.ne.s32.totalorder %s3729_s2, %s2663_s21 }
  0x1a   : > { %p2670_p3 = scmp.lt.u32.totalorder %s2663_s21, %s3729_s2 }
  0x1b   : > { %p3005_p0 = pneg %p2989_p12 }
  0x1d   : > { %p2666_p1 = pnand %p3005_p0, %p2664_p13 }
  0x1f   : > { %p2667_p2 = pneg %p2666_p1 }
  0x21   : > { %p2672_p4 = pnand %p2670_p3, %p2667_p2 }
  0x23   : > { %2675 = shalt.err (!%p2672_p4)
}
  0x24   : > { %s2676_s22 = scalar_lea.vmem %s2985_s27, 2048  ;;  %p2684_p9 = scmp.lt.s32.totalorder %s2985_s27, %s2985_s27 }
  0x25   : > { %p2677_p7 = scmp.ne.s32.totalorder %s2985_s27, %s2676_s22  ;;  %p2685_p6 = scmp.lt.s32.totalorder %s2676_s22, %s2676_s22 }
  0x27   : > { %p2679_p8 = pnand %p2677_p7, %p3005_p0  ;;  %p2686_p13 = por %p2685_p6, %p2684_p9 }
  0x29   : > { %p2680_p11 = pneg %p2679_p8 }
  0x2b   : > { %p2687_p1 = pnand %p2686_p13, %p2680_p11 }
  0x2d   : > { %2690 = shalt.err (!%p2687_p1)
}
  0x2e   : > { %s2862_s18 = smov 128   ;;  %s2863_s20 = smov 8  }
  0x2f   : > { %2439 = dma.hbm_to_vmem [thread:$0]  (!%p2989_p12), %s3729_s2, 2048, %s2985_s27, [#allocation7], %s2862_s18, %s2862_s18, %s2863_s20  }
  0x30   : > { %s2691_s22 = scalar_lea.hbm %s3728_s1, 32768 }
  0x31   : > { %p2692_p6 = scmp.ne.s32.totalorder %s3728_s1, %s2691_s22  ;;  %p2698_p3 = scmp.lt.u32.totalorder %s2691_s22, %s3728_s1 }
  0x33   : > { %p2694_p9 = pnand %p2692_p6, %p3005_p0 }
  0x35   : > { %p2695_p2 = pneg %p2694_p9 }
  0x37   : > { %p2700_p4 = pnand %p2698_p3, %p2695_p2 }
  0x39   : > { %2703 = shalt.err (!%p2700_p4)
}
  0x3a   : > { %s2704_s27 = scalar_lea.vmem %s2993_s30, 32768  ;;  %p2712_p13 = scmp.lt.s32.totalorder %s2993_s30, %s2993_s30 }
  0x3b   : > { %p2705_p7 = scmp.ne.s32.totalorder %s2993_s30, %s2704_s27  ;;  %p2713_p1 = scmp.lt.s32.totalorder %s2704_s27, %s2704_s27 }
  0x3d   : > { %p2707_p8 = pnand %p2705_p7, %p3005_p0  ;;  %p2714_p6 = por %p2713_p1, %p2712_p13 }
  0x3f   : > { %p2708_p11 = pneg %p2707_p8 }
  0x41   : > { %p2715_p9 = pnand %p2714_p6, %p2708_p11 }
  0x43   : > { %2718 = shalt.err (!%p2715_p9)
}
  0x44   : > { %2436 = dma.hbm_to_vmem [thread:$0]  (!%p2989_p12), %s3728_s1, 32768, %s2993_s30, [#allocation4], %s2862_s18, %s2862_s18, %s2863_s20  }
  0x45   : > { %s2719_s21 = scalar_lea.hbm %s3732_s5, 2048 }
  0x46   : > { %p2720_p2 = scmp.ne.s32.totalorder %s3732_s5, %s2719_s21  ;;  %p2726_p7 = scmp.lt.u32.totalorder %s2719_s21, %s3732_s5 }
  0x48   : > { %p2722_p3 = pnand %p2720_p2, %p3005_p0 }
  0x4a   : > { %p2723_p4 = pneg %p2722_p3 }
  0x4c   : > { %p2728_p8 = pnand %p2726_p7, %p2723_p4 }
  0x4e   : > { %2731 = shalt.err (!%p2728_p8)
}
  0x4f   : > { %s2732_s27 = scalar_lea.vmem %s317_s12, 2048  ;;  %p2740_p6 = scmp.lt.s32.totalorder %s317_s12, %s317_s12 }
  0x50   : > { %p2733_p11 = scmp.ne.s32.totalorder %s317_s12, %s2732_s27  ;;  %p2741_p9 = scmp.lt.s32.totalorder %s2732_s27, %s2732_s27 }
  0x52   : > { %p2735_p13 = pnand %p2733_p11, %p3005_p0  ;;  %p2742_p5 = por %p2741_p9, %p2740_p6 }
  0x54   : > { %p2736_p1 = pneg %p2735_p13 }
  0x56   : > { %p2743_p10 = pnand %p2742_p5, %p2736_p1 }
  0x58   : > { %2746 = shalt.err (!%p2743_p10)
}
  0x59   : > { %2442 = dma.hbm_to_vmem [thread:$0]  (!%p2989_p12), %s3732_s5, 2048, %s317_s12, [#allocation7], %s2862_s18, %s2862_s18, %s2863_s20  }
  0x5a   : > { %s2864_s16 = smov [#allocation9]   ;;  %s2747_s26 = scalar_lea.hbm %s3734_s7, 8192 }
  0x5b   : > { %s332_s19 = sshll.u32 %s2864_s16, 4  ;;  %p2748_p5 = scmp.ne.s32.totalorder %s3734_s7, %s2747_s26  ;;  %s333_s19 = int_to_ptr.vmem [resolvable:$true] %s332_s19 }
  0x5c   : > { %p2754_p3 = scmp.lt.u32.totalorder %s2747_s26, %s3734_s7 }
  0x5d   : > { %p2750_p10 = pnand %p2748_p5, %p3005_p0 }
  0x5f   : > { %p2751_p2 = pneg %p2750_p10 }
  0x61   : > { %p2756_p4 = pnand %p2754_p3, %p2751_p2 }
  0x63   : > { %2759 = shalt.err (!%p2756_p4)
}
  0x64   : > { %s2760_s12 = scalar_lea.vmem %s333_s19, 8192  ;;  %p2768_p13 = scmp.lt.s32.totalorder %s333_s19, %s333_s19 }
  0x65   : > { %p2761_p7 = scmp.ne.s32.totalorder %s333_s19, %s2760_s12  ;;  %p2769_p1 = scmp.lt.s32.totalorder %s2760_s12, %s2760_s12 }
  0x67   : > { %p2763_p8 = pnand %p2761_p7, %p3005_p0  ;;  %p2770_p6 = por %p2769_p1, %p2768_p13 }
  0x69   : > { %p2764_p11 = pneg %p2763_p8 }
  0x6b   : > { %p2771_p9 = pnand %p2770_p6, %p2764_p11 }
  0x6d   : > { %2774 = shalt.err (!%p2771_p9)
}
  0x6e   : > { %2445 = dma.hbm_to_vmem [thread:$0]  (!%p2989_p12), %s3734_s7, 8192, %s333_s19, [#allocation10], %s2862_s18, %s2862_s18, %s2863_s20  }
  0x6f   : > { %p3758_p5 = scmp.ne.s32.totalorder %s3755_s25, 0 }
  0x70   : > { %p3759_p0 = scmp.eq.s32.totalorder (!%p3758_p5), %s2951_s17, 0 }
  0x71   : > { %364 = sbr.rel (%p3758_p5) target bundleno = 1784 (0x6f8), region = 60 }
  0x78   : > { %2824 = dma.done.wait (%p3759_p0), [#allocation4], 32768   ;;  %p3760_p10 = pmov %p3759_p0 }
  0x79   : > { %p3761_p2 = pmov %p3759_p0 }
  0x7a   : > { %2826 = vsyncadd (%p3760_p10), [#allocation4], 4294934528 }
  0x7b   : > { %2828 = dma.done.wait (%p3761_p2), [#allocation7], 4096   ;;  %p3762_p3 = pmov %p3759_p0 }
  0x7c   : > { %p3763_p4 = pmov %p3759_p0 }
  0x7d   : > { %2830 = vsyncadd (%p3762_p3), [#allocation7], 4294963200 }
  0x7e   : > { %2832 = dma.done.wait (%p3763_p4), [#allocation10], 8192   ;;  %p3764_p12 = pmov %p3759_p0 }
  0x7f   : > { %s2052_s15 = sshll.u32 %s2951_s17, 3  ;;  %s412_s25 = sand.u32 1, %s2845_s14  }
  0x80   : > { %2834 = vsyncadd (%p3764_p12), [#allocation10], 4294959104  ;;  %p416_p7 = scmp.lt.s32.totalorder %s2052_s15, 15  ;;  %s3116_s28 = sshll.u32 %s412_s25, 3 }
  0x81   : > { %s414_s24 = scalar_lea.vmem [#allocation11], %s3116_s28  ;;  %s3252_s21 = smov 0  }
  0x82   : > { %s3780_s15 = smov (!%p416_p7, %s2052_s15), 15 }
  0x83   : > { %s2115_s18 = sshll.u32 %s3780_s15, 5 }
  0x84   : > { %s3121_s19 = scalar_lea.vmem %s3727_s0, %s2115_s18 }
  0x85   : > { %v3124_v0 = vld [vmem:[%s3121_s19] sm:$0xff]  ;;  %v3127_v1 = vld [vmem:[%s3121_s19 + $0x8] sm:$0xff]  ;;  %v3130_v2 = vld [vmem:[%s3121_s19 + $0x10] sm:$0xff] }
  0x86   : > { %v3133_v3 = vld [vmem:[%s3121_s19 + $0x18] sm:$0xff]  ;;  %v3136_v4 = vld [vmem:[%s3121_s19 + $0x20] sm:$0xff]  ;;  %v3139_v5 = vld [vmem:[%s3121_s19 + $0x28] sm:$0xff] }
  0x87   : > { %v3144_v7 = vld [vmem:[%s3121_s19 + $0x30] sm:$0xff]  ;;  %v3147_v8 = vld [vmem:[%s3121_s19 + $0x38] sm:$0xff]  ;;  %v3150_v9 = vld [vmem:[%s3121_s19 + $0x40] sm:$0xff] }
  0x88   : > { %v3155_v11 = vld [vmem:[%s3121_s19 + $0x48] sm:$0xff]  ;;  %v3158_v12 = vld [vmem:[%s3121_s19 + $0x50] sm:$0xff]  ;;  %v3161_v13 = vld [vmem:[%s3121_s19 + $0x58] sm:$0xff] }
  0x89   : > { %v3168_v16 = vld [vmem:[%s3121_s19 + $0x60] sm:$0xff]  ;;  %v3171_v17 = vld [vmem:[%s3121_s19 + $0x68] sm:$0xff]  ;;  %v3174_v18 = vld [vmem:[%s3121_s19 + $0x70] sm:$0xff]  ;;  %v458_v19 = vpack.c.bf16 %v3158_v12, %v3150_v9  ;;  %v459_v20 = vpack.c.bf16 %v3161_v13, %v3155_v11 }
  0x8a   : > { %v3181_v21 = vld [vmem:[%s3121_s19 + $0x78] sm:$0xff]  ;;  %v3184_v22 = vld [vmem:[%s3121_s19 + $0x80] sm:$0xff]  ;;  %v3187_v23 = vld [vmem:[%s3121_s19 + $0x88] sm:$0xff]  ;;  %v460_v24 = vpack.c.bf16 %v3174_v18, %v3168_v16 }
  0x8b   : > { %v3192_v25 = vld [vmem:[%s3121_s19 + $0x90] sm:$0xff]  ;;  %v3195_v26 = vld [vmem:[%s3121_s19 + $0x98] sm:$0xff]  ;;  %v3198_v27 = vld [vmem:[%s3121_s19 + $0xa0] sm:$0xff]  ;;  %v461_v28 = vpack.c.bf16 %v3181_v21, %v3171_v17 }
  0x8c   : > { %v3203_v29 = vld [vmem:[%s3121_s19 + $0xa8] sm:$0xff]  ;;  %v3206_v30 = vld [vmem:[%s3121_s19 + $0xb0] sm:$0xff]  ;;  %v3209_v31 = vld [vmem:[%s3121_s19 + $0xb8] sm:$0xff]  ;;  %v462_v32 = vpack.c.bf16 %v3192_v25, %v3184_v22  ;;  %v463_v33 = vpack.c.bf16 %v3195_v26, %v3187_v23 }
  0x8d   : > { %v3216_v34 = vld [vmem:[%s3121_s19 + $0xc0] sm:$0xff]  ;;  %v3219_v35 = vld [vmem:[%s3121_s19 + $0xc8] sm:$0xff]  ;;  %v3222_v36 = vld [vmem:[%s3121_s19 + $0xd0] sm:$0xff]  ;;  %v464_v37 = vpack.c.bf16 %v3206_v30, %v3198_v27  ;;  %v465_v38 = vpack.c.bf16 %v3209_v31, %v3203_v29 }
  0x8e   : > { %v3229_v39 = vld [vmem:[%s3121_s19 + $0xd8] sm:$0xff]  ;;  %v3232_v40 = vld [vmem:[%s3121_s19 + $0xe0] sm:$0xff]  ;;  %v3235_v41 = vld [vmem:[%s3121_s19 + $0xe8] sm:$0xff]  ;;  %v466_v42 = vpack.c.bf16 %v3222_v36, %v3216_v34 }
  0x8f   : > { %v3240_v43 = vld [vmem:[%s3121_s19 + $0xf0] sm:$0xff]  ;;  %v3243_v44 = vld [vmem:[%s3121_s19 + $0xf8] sm:$0xff]  ;;  %v467_v45 = vpack.c.bf16 %v3229_v39, %v3219_v35 }
  0x90   : > { %v468_v46 = vpack.c.bf16 %v3240_v43, %v3232_v40  ;;  %v469_v47 = vpack.c.bf16 %v3243_v44, %v3235_v41 }
  0x91 LB: >> { %v3765_v10 = vpack.c.bf16 %v3133_v3, %v3127_v1  ;;  %s2116_s26 = sshll.u32 %s2857_s21, 8  ;;  %v3766_v6 = vpack.c.bf16 %v3130_v2, %v3124_v0  ;;  %v3767_v15 = vpack.c.bf16 %v3147_v8, %v3139_v5  ;;  %v3768_v14 = vpack.c.bf16 %v3144_v7, %v3136_v4  ;;  %s3342_s11 = sshll.u32 %s2857_s21, 4  ;;  %s2857_s21 = sphi %s3252_s21, %s475_s21  }
  0x92   : >> { %s3261_s29 = scalar_lea.vmem [#allocation3], %s2116_s26  ;;  %s788_s12 = scalar_lea.vmem %s3730_s3, %s3342_s11  ;;  %vm1010_vm4 = vcmask 31744  }
  0x93   : >> { %703 = vmatprep.mubr.bf16.mxu0 %v3765_v10  ;;  %v2515_v48 = vld [vmem:[%s3261_s29 + $0x4] ss:$8 sps:$4 sm:$0xff]   ;;  %v2517_v49 = vld [vmem:[%s3261_s29] ss:$8 sps:$4 sm:$0xff]   ;;  %v2518_v50 = vld [vmem:[%s3261_s29 + $0x14] ss:$8 sps:$4 sm:$0xff]  }
  0x94   : >> { %671 = vmatprep.subr.bf16.mxu0 %v2515_v48  ;;  %v2520_v51 = vld [vmem:[%s3261_s29 + $0x10] ss:$8 sps:$4 sm:$0xff]   ;;  %v2521_v52 = vld [vmem:[%s3261_s29 + $0x24] ss:$8 sps:$4 sm:$0xff]   ;;  %v2523_v53 = vld [vmem:[%s3261_s29 + $0x20] ss:$8 sps:$4 sm:$0xff]  }
  0x95   : >> { %672 = vmatpush1.bf16.msra.mxu0 %v2517_v49  ;;  %v2524_v54 = vld [vmem:[%s3261_s29 + $0x34] ss:$8 sps:$4 sm:$0xff]   ;;  %v2526_v55 = vld [vmem:[%s3261_s29 + $0x30] ss:$8 sps:$4 sm:$0xff]   ;;  %v2527_v56 = vld [vmem:[%s3261_s29 + $0x44] ss:$8 sps:$4 sm:$0xff]  }
  0x96   : >> { %673 = vmatprep.subr.bf16.mxu0 %v2518_v50  ;;  %v2529_v57 = vld [vmem:[%s3261_s29 + $0x40] ss:$8 sps:$4 sm:$0xff]   ;;  %v2530_v58 = vld [vmem:[%s3261_s29 + $0x54] ss:$8 sps:$4 sm:$0xff]   ;;  %v2532_v59 = vld [vmem:[%s3261_s29 + $0x50] ss:$8 sps:$4 sm:$0xff]  }
  0x97   : >> { %v2533_v60 = vld [vmem:[%s3261_s29 + $0x64] ss:$8 sps:$4 sm:$0xff]   ;;  %v2535_v61 = vld [vmem:[%s3261_s29 + $0x60] ss:$8 sps:$4 sm:$0xff]   ;;  %v2536_v62 = vld [vmem:[%s3261_s29 + $0x74] ss:$8 sps:$4 sm:$0xff]  }
  0x98   : >> { %v2538_v63 = vld [vmem:[%s3261_s29 + $0x70] ss:$8 sps:$4 sm:$0xff]   ;;  %v2539_v48 = vld [vmem:[%s3261_s29 + $0x84] ss:$8 sps:$4 sm:$0xff]   ;;  %v2541_v49 = vld [vmem:[%s3261_s29 + $0x80] ss:$8 sps:$4 sm:$0xff]  }
  0x99   : >> { %674 = vmatpush1.bf16.msra.mxu0 %v2520_v51  ;;  %v2542_v50 = vld [vmem:[%s3261_s29 + $0x94] ss:$8 sps:$4 sm:$0xff]   ;;  %v2544_v51 = vld [vmem:[%s3261_s29 + $0x90] ss:$8 sps:$4 sm:$0xff]   ;;  %s785_s30 = scalar_lea.vmem [#allocation6], %s3342_s11  ;;  %s1009_s16 = scalar_lea.vmem [#allocation2], %s3342_s11 }
  0x9a   : >> { %675 = vmatprep.subr.bf16.mxu0 %v2521_v52  ;;  %v2545_v52 = vld [vmem:[%s3261_s29 + $0xa4] ss:$8 sps:$4 sm:$0xff]   ;;  %s475_s21 = sadd.s32 1, %s2857_s21  }
  0x9b   : >> { %p472_p8 = scmp.ge.s32.totalorder %s475_s21, 8  }
  0x9c   : > { %v1045_v3 = vld [vmem:[%s3733_s6] sm:$0xff] (%p472_p8)  ;;  %v1046_v4 = vld [vmem:[%s3733_s6 + $0x8] sm:$0xff] (%p472_p8)  ;;  %v1047_v5 = vld [vmem:[%s3733_s6 + $0x10] sm:$0xff] (%p472_p8)  ;;  %s2112_s13 = sshll.u32 (%p472_p8), %s2951_s17, 7  ;;  %s1926_s15 = sshll.u32 (%p472_p8), %s414_s24, 4  ;;  %s3683_s15 = int_to_ptr.vmem [resolvable:$true] %s1926_s15 }
  0x9d   : >> { %676 = vmatpush1.bf16.msra.mxu0 %v2523_v53  ;;  %v2547_v53 = vld [vmem:[%s3261_s29 + $0xa0] ss:$8 sps:$4 sm:$0xff]   ;;  %v1048_v11 = vld [vmem:[%s3733_s6 + $0x18] sm:$0xff] (%p472_p8)  ;;  %v1055_v27 = vld [vmem:[%s3733_s6 + $0x50] sm:$0xff] (%p472_p8)  ;;  %s3681_s20 = scalar_lea.hbm (%p472_p8), %s3737_s10, %s2112_s13  ;;  %s2775_s17 = scalar_lea.vmem (%p472_p8), %s3683_s15, 128 }
  0x9e   : >> { %677 = vmatprep.subr.bf16.mxu0 %v2524_v54  ;;  %v2548_v54 = vld [vmem:[%s3261_s29 + $0xb4] ss:$8 sps:$4 sm:$0xff]   ;;  %v1049_v12 = vld [vmem:[%s3733_s6 + $0x20] sm:$0xff] (%p472_p8)  ;;  %v1050_v18 = vld [vmem:[%s3733_s6 + $0x28] sm:$0xff] (%p472_p8)  ;;  %p2776_p11 = scmp.ne.s32.totalorder (%p472_p8), %s3683_s15, %s2775_s17  ;;  %p3769_p13 = scmp.ne.s32.totalorder (%p472_p8), %s3752_s23, 0 }
  0x9f   : > { %v1052_v23 = vld [vmem:[%s3733_s6 + $0x38] sm:$0xff] (%p472_p8)  ;;  %v1054_v26 = vld [vmem:[%s3733_s6 + $0x48] sm:$0xff] (%p472_p8)  ;;  %v1057_v30 = vld [vmem:[%s3733_s6 + $0x60] sm:$0xff] (%p472_p8)  ;;  %s2874_s21 = smov (%p472_p8), [#allocation11]  }
  0xa0   : > { %v1030_v29 = vld [vmem:[#allocation8 + $0x8] sm:$0xff] (%p472_p8)  ;;  %v1031_v31 = vld [vmem:[#allocation8 + $0x10] sm:$0xff] (%p472_p8)  ;;  %v1033_v35 = vld [vmem:[#allocation8 + $0x20] sm:$0xff] (%p472_p8)  ;;  %p2777_p1 = pnand (%p472_p8), %p2776_p11, %p3769_p13  ;;  %s2779_s11 = sshll.u32 (%p472_p8), %s2874_s21, 4  ;;  %s2780_s11 = int_to_ptr.vmem [resolvable:$false] %s2779_s11 }
  0xa1   : >> { %678 = vmatpush1.bf16.msra.mxu0 %v2526_v55  ;;  %v2550_v55 = vld [vmem:[%s3261_s29 + $0xb0] ss:$8 sps:$4 sm:$0xff]   ;;  %v1037_v40 = vld [vmem:[#allocation8 + $0x40] sm:$0xff] (%p472_p8)  ;;  %v1038_v41 = vld [vmem:[#allocation8 + $0x48] sm:$0xff] (%p472_p8)  ;;  %s2781_s19 = scalar_lea.vmem (%p472_p8), %s2780_s11, 256  ;;  %p2782_p9 = scmp.lt.s32.totalorder (%p472_p8), %s3683_s15, %s2780_s11 }
  0xa2   : >> { %679 = vmatprep.subr.bf16.mxu0 %v2527_v56  ;;  %v2551_v56 = vld [vmem:[%s3261_s29 + $0xc4] ss:$8 sps:$4 sm:$0xff]   ;;  %v1059_v34 = vld [vmem:[%s3733_s6 + $0x70] sm:$0xff] (%p472_p8)  ;;  %v1060_v36 = vld [vmem:[%s3733_s6 + $0x78] sm:$0xff] (%p472_p8)  ;;  %p2778_p6 = pneg (%p472_p8), %p2777_p1  ;;  %p2783_p5 = scmp.lt.s32.totalorder (%p472_p8), %s2781_s19, %s2775_s17 }
  0xa3   : > { %v1036_v39 = vld [vmem:[#allocation8 + $0x38] sm:$0xff] (%p472_p8)  ;;  %v1041_v44 = vld [vmem:[#allocation8 + $0x60] sm:$0xff] (%p472_p8) }
  0xa4   : > { %v1040_v43 = vld [vmem:[#allocation8 + $0x58] sm:$0xff] (%p472_p8)  ;;  %p2784_p0 = por (%p472_p8), %p2783_p5, %p2782_p9 }
  0xa5   : >> { %680 = vmatpush1.bf16.msra.mxu0 %v2529_v57  ;;  %v2553_v57 = vld [vmem:[%s3261_s29 + $0xc0] ss:$8 sps:$4 sm:$0xff]  }
  0xa6   : >> { %681 = vmatprep.subr.bf16.mxu0 %v2530_v58  ;;  %v2554_v58 = vld [vmem:[%s3261_s29 + $0xd4] ss:$8 sps:$4 sm:$0xff]   ;;  %p2785_p10 = pnand (%p472_p8), %p2784_p0, %p2778_p6 }
  0xa9   : >> { %682 = vmatpush1.bf16.msra.mxu0 %v2532_v59  ;;  %v2556_v59 = vld [vmem:[%s3261_s29 + $0xd0] ss:$8 sps:$4 sm:$0xff]  }
  0xaa   : >> { %683 = vmatprep.subr.bf16.mxu0 %v2533_v60  ;;  %v2557_v60 = vld [vmem:[%s3261_s29 + $0xe4] ss:$8 sps:$4 sm:$0xff]  }
  0xad   : >> { %684 = vmatpush1.bf16.msra.mxu0 %v2535_v61  ;;  %v2559_v61 = vld [vmem:[%s3261_s29 + $0xe0] ss:$8 sps:$4 sm:$0xff]  }
  0xae   : >> { %685 = vmatprep.subr.bf16.mxu0 %v2536_v62  ;;  %v2560_v62 = vld [vmem:[%s3261_s29 + $0xf4] ss:$8 sps:$4 sm:$0xff]  }
  0xb1   : >> { %686 = vmatpush1.bf16.msra.mxu0 %v2538_v63  ;;  %v2562_v63 = vld [vmem:[%s3261_s29 + $0xf0] ss:$8 sps:$4 sm:$0xff]  }
  0xb2   : >> { %687 = vmatprep.subr.bf16.mxu0 %v2539_v48  ;;  %v2865_v48 = vmov 0.0  }
  0xb3   : >> { %865 = vmatprep.mubr.f32.mxu1 %v2865_v48 }
  0xb5   : >> { %688 = vmatpush1.bf16.msra.mxu0 %v2541_v49  ;;  %v2866_v49 = vmov 0  }
  0xb6   : >> { %689 = vmatprep.subr.bf16.mxu0 %v2542_v50  ;;  %2514 = vset.pattern.permute.xlu0 %v2866_v49  ;;  %v789_v50 = vld [vmem:[%s788_s12] sm:$0xff] }
  0xb7   : >> { %793 = vperm.xlu0 %2514, %v789_v50  }
  0xb9   : >> { %690 = vmatpush1.bf16.msra.mxu0 %v2544_v51  ;;  %v790_v51 = vld [vmem:[%s788_s12 + $0x8] sm:$0xff] }
  0xba   : >> { %691 = vmatprep.subr.bf16.mxu0 %v2545_v52 }
  0xbb   : >> { %798 = vperm.xlu0 %2514, %v790_v51  }
  0xbd   : >> { %692 = vmatpush1.bf16.msra.mxu0 %v2547_v53 }
  0xbe   : >> { %693 = vmatprep.subr.bf16.mxu0 %v2548_v54 }
  0xc1   : >> { %694 = vmatpush1.bf16.msra.mxu0 %v2550_v55 }
  0xc2   : >> { %695 = vmatprep.subr.bf16.mxu0 %v2551_v56 }
  0xc5   : >> { %696 = vmatpush1.bf16.msra.mxu0 %v2553_v57 }
  0xc6   : >> { %697 = vmatprep.subr.bf16.mxu0 %v2554_v58 }
  0xc9   : >> { %698 = vmatpush1.bf16.msra.mxu0 %v2556_v59 }
  0xca   : >> { %699 = vmatprep.subr.bf16.mxu0 %v2557_v60 }
  0xcd   : >> { %700 = vmatpush1.bf16.msra.mxu0 %v2559_v61 }
  0xce   : >> { %701 = vmatprep.subr.bf16.mxu0 %v2560_v62 }
  0xd1   : >> { %702 = vmatpush1.bf16.msra.mxu0 %v2562_v63 }
  0xd4   : >> { %704 = vmatmul.mubr.bf16.vlgmr.msra.gmra.mrb[0].mxu0 %v3766_v6 }
  0xd5   : >> { %713 = vmatprep.mubr.bf16.mxu0 %v3767_v15 }
  0xdc   : >> { %714 = vmatmul.mubr.bf16.gmra.mrb[4].mxu0 %v3768_v14 }
  0xdd   : >> { %723 = vmatprep.mubr.bf16.mxu0 %v459_v20 }
  0xe4   : >> { %724 = vmatmul.mubr.bf16.gmra.mrb[8].mxu0 %v458_v19  ;;  %v1051_v19 = vld [vmem:[%s3733_s6 + $0x30] sm:$0xff] (%p472_p8) }
  0xe5   : >> { %733 = vmatprep.mubr.bf16.mxu0 %v461_v28  ;;  %v1056_v28 = vld [vmem:[%s3733_s6 + $0x58] sm:$0xff] (%p472_p8) }
  0xec   : >> { %734 = vmatmul.mubr.bf16.gmra.mrb[12].mxu0 %v460_v24  ;;  %v1053_v24 = vld [vmem:[%s3733_s6 + $0x40] sm:$0xff] (%p472_p8) }
  0xed   : >> { %743 = vmatprep.mubr.bf16.mxu0 %v463_v33  ;;  %v1032_v33 = vld [vmem:[#allocation8 + $0x18] sm:$0xff] (%p472_p8) }
  0xf4   : >> { %744 = vmatmul.mubr.bf16.gmra.mrb[16].mxu0 %v462_v32  ;;  %v1058_v32 = vld [vmem:[%s3733_s6 + $0x68] sm:$0xff] (%p472_p8) }
  0xf5   : >> { %753 = vmatprep.mubr.bf16.mxu0 %v465_v38  ;;  %v1035_v38 = vld [vmem:[#allocation8 + $0x30] sm:$0xff] (%p472_p8) }
  0xfc   : >> { %754 = vmatmul.mubr.bf16.gmra.mrb[20].mxu0 %v464_v37  ;;  %v1034_v37 = vld [vmem:[#allocation8 + $0x28] sm:$0xff] (%p472_p8) }
  0xfd   : >> { %763 = vmatprep.mubr.bf16.mxu0 %v467_v45  ;;  %v1042_v45 = vld [vmem:[#allocation8 + $0x68] sm:$0xff] (%p472_p8) }
 0x104   : >> { %764 = vmatmul.mubr.bf16.gmra.mrb[24].mxu0 %v466_v42  ;;  %v1039_v42 = vld [vmem:[#allocation8 + $0x50] sm:$0xff] (%p472_p8) }
 0x105   : >> { %773 = vmatprep.mubr.bf16.mxu0 %v469_v47  ;;  %v1044_v47 = vld [vmem:[#allocation8 + $0x78] sm:$0xff] (%p472_p8) }
 0x10c   : >> { %774 = vmatmul.mubr.bf16.gmra.mrb[28].mxu0 %v468_v46  ;;  %v1043_v46 = vld [vmem:[#allocation8 + $0x70] sm:$0xff] (%p472_p8) }
 0x1a7   : >> { %v705_v52 = vpop.f32.mrb[0].mxu0 }
 0x1a8   : >> { %v707_v53 = vpop.f32.mrb[1].mxu0 }
 0x1a9   : >> { %v709_v54 = vpop.f32.mrb[2].mxu0 }
 0x1aa   : >> { %v2297_v55 = vpack.c.bf16 %v709_v54, %v705_v52  ;;  %v711_v56 = vpop.f32.mrb[3].mxu0 }
 0x1ab   : >> { %v2295_v57 = vpack.c.bf16 %v711_v56, %v707_v53 }
 0x1ad   : >> { %2296 = vmatprep.subr.bf16.mxu1 %v2295_v57 }
 0x1ae   : >> { %2298 = vmatpush1.bf16.msra.mxu1 %v2297_v55 }
 0x1af   : >> { %v715_v58 = vpop.f32.mrb[4].mxu0 }
 0x1b0   : >> { %v717_v59 = vpop.f32.mrb[5].mxu0 }
 0x1b1   : >> { %v719_v60 = vpop.f32.mrb[6].mxu0 }
 0x1b2   : >> { %v2301_v61 = vpack.c.bf16 %v719_v60, %v715_v58  ;;  %v721_v62 = vpop.f32.mrb[7].mxu0 }
 0x1b3   : >> { %v2299_v63 = vpack.c.bf16 %v721_v62, %v717_v59 }
 0x1b5   : >> { %2300 = vmatprep.subr.bf16.mxu1 %v2299_v63 }
 0x1b6   : >> { %2302 = vmatpush1.bf16.msra.mxu1 %v2301_v61 }
 0x1b7   : >> { %v725_v49 = vpop.f32.mrb[8].mxu0 }
 0x1b8   : >> { %v727_v50 = vpop.f32.mrb[9].mxu0 }
 0x1b9   : >> { %v729_v6 = vpop.f32.mrb[10].mxu0 }
 0x1ba   : >> { %v2305_v51 = vpack.c.bf16 %v729_v6, %v725_v49  ;;  %v731_v10 = vpop.f32.mrb[11].mxu0 }
 0x1bb   : >> { %v2303_v14 = vpack.c.bf16 %v731_v10, %v727_v50 }
 0x1bd   : >> { %2304 = vmatprep.subr.bf16.mxu1 %v2303_v14 }
 0x1be   : >> { %2306 = vmatpush1.bf16.msra.mxu1 %v2305_v51 }
 0x1bf   : >> { %v735_v52 = vpop.f32.mrb[12].mxu0 }
 0x1c0   : >> { %v737_v53 = vpop.f32.mrb[13].mxu0 }
 0x1c1   : >> { %v739_v54 = vpop.f32.mrb[14].mxu0 }
 0x1c2   : >> { %v2309_v55 = vpack.c.bf16 %v739_v54, %v735_v52  ;;  %v741_v56 = vpop.f32.mrb[15].mxu0 }
 0x1c3   : >> { %v2307_v57 = vpack.c.bf16 %v741_v56, %v737_v53 }
 0x1c5   : >> { %2308 = vmatprep.subr.bf16.mxu1 %v2307_v57 }
 0x1c6   : >> { %2310 = vmatpush1.bf16.msra.mxu1 %v2309_v55 }
 0x1c7   : >> { %v745_v58 = vpop.f32.mrb[16].mxu0 }
 0x1c8   : >> { %v747_v59 = vpop.f32.mrb[17].mxu0 }
 0x1c9   : >> { %v749_v60 = vpop.f32.mrb[18].mxu0 }
 0x1ca   : >> { %v2313_v61 = vpack.c.bf16 %v749_v60, %v745_v58  ;;  %v751_v62 = vpop.f32.mrb[19].mxu0  ;;  %v918_v60 = vld [vmem:[%s3731_s4 + $0x80] sm:$0xff] }
 0x1cb   : >> { %v2311_v63 = vpack.c.bf16 %v751_v62, %v747_v59 }
 0x1cd   : >> { %2312 = vmatprep.subr.bf16.mxu1 %v2311_v63 }
 0x1ce   : >> { %2314 = vmatpush1.bf16.msra.mxu1 %v2313_v61  ;;  %v919_v61 = vld [vmem:[%s3731_s4 + $0x88] sm:$0xff] }
 0x1cf   : >> { %v755_v6 = vpop.f32.mrb[20].mxu0 }
 0x1d0   : >> { %v757_v10 = vpop.f32.mrb[21].mxu0 }
 0x1d1   : >> { %v759_v14 = vpop.f32.mrb[22].mxu0 }
 0x1d2   : >> { %v2317_v49 = vpack.c.bf16 %v759_v14, %v755_v6  ;;  %v761_v50 = vpop.f32.mrb[23].mxu0  ;;  %v2327_v14 = vpack.c.bf16 %v919_v61, %v918_v60  ;;  %v787_v60 = vld [vmem:[%s785_s30 + $0x8] sm:$0xff] }
 0x1d3   : >> { %v2315_v51 = vpack.c.bf16 %v761_v50, %v757_v10  ;;  %v903_v50 = vld [vmem:[%s3731_s4 + $0x8] sm:$0xff] }
 0x1d5   : >> { %2316 = vmatprep.subr.bf16.mxu1 %v2315_v51  ;;  %v920_v51 = vld [vmem:[%s3731_s4 + $0x90] sm:$0xff] }
 0x1d6   : >> { %2318 = vmatpush1.bf16.msra.mxu1 %v2317_v49  ;;  %v902_v49 = vld [vmem:[%s3731_s4] sm:$0xff] }
 0x1d7   : >> { %v765_v52 = vpop.f32.mrb[24].mxu0 }
 0x1d8   : >> { %v767_v53 = vpop.f32.mrb[25].mxu0 }
 0x1d9   : >> { %v769_v54 = vpop.f32.mrb[26].mxu0 }
 0x1da   : >> { %v2321_v55 = vpack.c.bf16 %v769_v54, %v765_v52  ;;  %v771_v56 = vpop.f32.mrb[27].mxu0  ;;  %v921_v52 = vld [vmem:[%s3731_s4 + $0x98] sm:$0xff]  ;;  %v2329_v54 = vpack.c.bf16 %v903_v50, %v902_v49  ;;  %v908_v50 = vld [vmem:[%s3731_s4 + $0x30] sm:$0xff] }
 0x1db   : >> { %v2319_v57 = vpack.c.bf16 %v771_v56, %v767_v53  ;;  %v786_v53 = vld [vmem:[%s785_s30] sm:$0xff]  ;;  %v904_v56 = vld [vmem:[%s3731_s4 + $0x10] sm:$0xff] }
 0x1dd   : >> { %2320 = vmatprep.subr.bf16.mxu1 %v2319_v57  ;;  %v905_v57 = vld [vmem:[%s3731_s4 + $0x18] sm:$0xff] }
 0x1de   : >> { %2322 = vmatpush1.bf16.msra.mxu1 %v2321_v55  ;;  %v2331_v55 = vpack.c.bf16 %v921_v52, %v920_v51  ;;  %v2333_v61 = vpack.c.bf16 %v905_v57, %v904_v56  ;;  %v909_v51 = vld [vmem:[%s3731_s4 + $0x38] sm:$0xff]  ;;  %v910_v56 = vld [vmem:[%s3731_s4 + $0x40] sm:$0xff]  ;;  %v911_v57 = vld [vmem:[%s3731_s4 + $0x48] sm:$0xff] }
 0x1df   : >> { %v775_v58 = vpop.f32.mrb[28].mxu0  ;;  %v2341_v52 = vpack.c.bf16 %v909_v51, %v908_v50  ;;  %v915_v50 = vld [vmem:[%s3731_s4 + $0x68] sm:$0xff] }
 0x1e0   : >> { %v777_v59 = vpop.f32.mrb[29].mxu0 }
 0x1e1   : >> { %v779_v62 = vpop.f32.mrb[30].mxu0 }
 0x1e2   : >> { %v2325_v63 = vpack.c.bf16 %v779_v62, %v775_v58  ;;  %v781_v6 = vpop.f32.mrb[31].mxu0  ;;  %v922_v58 = vld [vmem:[%s3731_s4 + $0xa0] sm:$0xff] }
 0x1e3   : >> { %v2323_v10 = vpack.c.bf16 %v781_v6, %v777_v59  ;;  %v923_v59 = vld [vmem:[%s3731_s4 + $0xa8] sm:$0xff] }
 0x1e4   : >> { %v2335_v62 = vpack.c.bf16 %v923_v59, %v922_v58  ;;  %v907_v6 = vld [vmem:[%s3731_s4 + $0x28] sm:$0xff]  ;;  %v2345_v58 = vpack.c.bf16 %v911_v57, %v910_v56  ;;  %v928_v59 = vld [vmem:[%s3731_s4 + $0xd0] sm:$0xff]  ;;  %v917_v56 = vld [vmem:[%s3731_s4 + $0x78] sm:$0xff] }
 0x1e5   : >> { %2324 = vmatprep.subr.bf16.mxu1 %v2323_v10 }
 0x1e6   : >> { %2326 = vmatpush1.bf16.msra.mxu1 %v2325_v63  ;;  %v906_v63 = vld [vmem:[%s3731_s4 + $0x20] sm:$0xff] }
 0x1e7   : >> { %2328 = vmatprep.subr.bf16.mxu1 %v2327_v14  ;;  %v2337_v10 = vpack.c.bf16 %v907_v6, %v906_v63  ;;  %v925_v14 = vld [vmem:[%s3731_s4 + $0xb8] sm:$0xff] }
 0x1e8   : >> { %v913_v63 = vld [vmem:[%s3731_s4 + $0x58] sm:$0xff] }
 0x1e9   : >> { %866 = vmatmul.mubr.f32.vlgmr.msra.gmra.mrb[0].mxu1 %v786_v53  ;;  %v926_v53 = vld [vmem:[%s3731_s4 + $0xc0] sm:$0xff] }
 0x1ea   : >> { %871 = vmatprep.mubr.f32.mxu1 %v2865_v48  ;;  %2330 = vmatpush3.bf16.msra.mxu1 %v2329_v54  ;;  %v924_v48 = vld [vmem:[%s3731_s4 + $0xb0] sm:$0xff]  ;;  %v927_v54 = vld [vmem:[%s3731_s4 + $0xc8] sm:$0xff] }
 0x1eb   : >> { %2332 = vmatprep.subr.bf16.mxu1 %v2331_v55  ;;  %v2339_v49 = vpack.c.bf16 %v925_v14, %v924_v48  ;;  %v2343_v55 = vpack.c.bf16 %v927_v54, %v926_v53  ;;  %v931_v48 = vld [vmem:[%s3731_s4 + $0xe8] sm:$0xff]  ;;  %v933_v53 = vld [vmem:[%s3731_s4 + $0xf8] sm:$0xff] }
 0x1ed   : >> { %872 = vmatmul.mubr.f32.gmra.mrb[2].mxu1 %v787_v60  ;;  %v929_v60 = vld [vmem:[%s3731_s4 + $0xd8] sm:$0xff] }
 0x1ee   : >> { %2334 = vmatpush3.bf16.msra.mxu1 %v2333_v61  ;;  %v2347_v61 = vpack.c.bf16 %v929_v60, %v928_v59 }
 0x1ef   : >> { %2336 = vmatprep.subr.bf16.mxu1 %v2335_v62  ;;  %v912_v62 = vld [vmem:[%s3731_s4 + $0x50] sm:$0xff] }
 0x1f0   : >> { %v2349_v6 = vpack.c.bf16 %v913_v63, %v912_v62 }
 0x1f2   : >> { %2338 = vmatpush3.bf16.msra.mxu1 %v2337_v10  ;;  %v930_v10 = vld [vmem:[%s3731_s4 + $0xe0] sm:$0xff] }
 0x1f3   : >> { %2340 = vmatprep.subr.bf16.mxu1 %v2339_v49  ;;  %v2351_v14 = vpack.c.bf16 %v931_v48, %v930_v10  ;;  %v914_v49 = vld [vmem:[%s3731_s4 + $0x60] sm:$0xff] }
 0x1f4   : >> { %v2353_v51 = vpack.c.bf16 %v915_v50, %v914_v49 }
 0x1f6   : >> { %2342 = vmatpush3.bf16.msra.mxu1 %v2341_v52  ;;  %v932_v52 = vld [vmem:[%s3731_s4 + $0xf0] sm:$0xff] }
 0x1f7   : >> { %2344 = vmatprep.subr.bf16.mxu1 %v2343_v55  ;;  %v2355_v54 = vpack.c.bf16 %v933_v53, %v932_v52  ;;  %v916_v55 = vld [vmem:[%s3731_s4 + $0x70] sm:$0xff] }
 0x1f8   : >> { %v2357_v57 = vpack.c.bf16 %v917_v56, %v916_v55 }
 0x1fa   : >> { %2346 = vmatpush3.bf16.msra.mxu1 %v2345_v58  ;;  %v794_v58 = vpop.permute.xlu0 %793 }
 0x1fb   : >> { %2348 = vmatprep.subr.bf16.mxu1 %v2347_v61 }
 0x1fe   : >> { %2350 = vmatpush3.bf16.msra.mxu1 %v2349_v6  ;;  %v799_v6 = vpop.permute.xlu0 %798 }
 0x1ff   : >> { %2352 = vmatprep.subr.bf16.mxu1 %v2351_v14 }
 0x202   : >> { %2354 = vmatpush3.bf16.msra.mxu1 %v2353_v51 }
 0x203   : >> { %2356 = vmatprep.subr.bf16.mxu1 %v2355_v54 }
 0x206   : >> { %2358 = vmatpush3.bf16.msra.mxu1 %v2357_v57 }
 0x2bc   : >> { %v867_v59 = vpop.f32.mrb[0].mxu1 }
 0x2bd   : >> { %v868_v60 = vadd.f32 %v867_v59, %v794_v58  ;;  %v869_v61 = vpop.f32.mrb[1].mxu1 }
 0x2be   : >> { %v870_v62 = vadd.f32 %v869_v61, %v794_v58 }
 0x2bf   : >> { %v882_v63 = vmin.f32 %v868_v60, 0.0  ;;  %vm878_vm1 = vcmp.gt.f32.partialorder %v868_v60, 0.0 }
 0x2c0   : >> { %v883_v10 = vmin.f32 %v870_v62, 0.0  ;;  %v873_v48 = vpop.f32.mrb[2].mxu1  ;;  %vm879_vm0 = vcmp.gt.f32.partialorder %v870_v62, 0.0 }
 0x2c1   : >> { %v886_v14 = vmul.f32 1.442695, %v882_v63  ;;  %v874_v49 = vadd.f32 %v873_v48, %v799_v6  ;;  %v875_v50 = vpop.f32.mrb[3].mxu1 }
 0x2c2   : >> { %v888_v51 = vmul.f32 1.442695, %v883_v10  ;;  %v876_v52 = vadd.f32 %v875_v50, %v799_v6 }
 0x2c3   : >> { %2563 = vpow2.f32 %v886_v14  ;;  %v884_v53 = vmin.f32 %v874_v49, 0.0  ;;  %vm880_vm3 = vcmp.gt.f32.partialorder %v874_v49, 0.0 }
 0x2c4   : >> { %2565 = vpow2.f32 %v888_v51  ;;  %v885_v55 = vmin.f32 %v876_v52, 0.0  ;;  %vm881_vm2 = vcmp.gt.f32.partialorder %v876_v52, 0.0 }
 0x2c5   : >> { %v890_v54 = vmul.f32 1.442695, %v884_v53 }
 0x2c6   : >> { %v892_v56 = vmul.f32 1.442695, %v885_v55 }
 0x2c7   : >> { %2567 = vpow2.f32 %v890_v54 }
 0x2c8   : >> { %2569 = vpow2.f32 %v892_v56 }
 0x2cd   : >> { %v2564_v57 = vpop.eup %2563 }
 0x2ce   : >> { %v2566_v59 = vpop.eup %2565  ;;  %v2090_v58 = vadd.f32 -1.0, %v2564_v57 }
 0x2cf   : >> { %v2091_v61 = vadd.f32 -1.0, %v2566_v59 }
 0x2d0   : >> { %v898_v10 = vsel %vm878_vm1, %v868_v60, %v2090_v58  ;;  %v2867_v58 = vmov (%p472_p8), 0  }
 0x2d1   : >> { %v2568_v15 = vpop.eup %2567  ;;  %v899_v63 = vsel %vm879_vm0, %v870_v62, %v2091_v61  ;;  %2571 = vset.pattern.permute.xlu0 (%p472_p8), %v2867_v58  ;;  %2572 = vset.pattern.permute.xlu1 (%p472_p8), %v2867_v58 }
 0x2d2   : >> { %v2570_v48 = vpop.eup %2569  ;;  %998 = vmatprep.mubr.f32.mxu1 %v899_v63  ;;  %v2092_v6 = vadd.f32 -1.0, %v2568_v15  ;;  %1063 = vperm.xlu0 (%p472_p8), %2571, %v1045_v3  }
 0x2d3   : >> { %999 = vmatmul.mubr.f32.vlgmr.msra.gmra.mrb[4].mxu1 %v898_v10  ;;  %v2093_v14 = vadd.f32 -1.0, %v2570_v48  ;;  %1073 = vperm.xlu1 (%p472_p8), %2572, %v1047_v5  }
 0x2d4   : >> { %v900_v51 = vsel %vm880_vm3, %v874_v49, %v2092_v6  ;;  %v1029_v6 = vld [vmem:[#allocation8] sm:$0xff] (%p472_p8) }
 0x2d5   : >> { %v901_v50 = vsel %vm881_vm2, %v876_v52, %v2093_v14  ;;  %2236 = vmatprep.mubr.f32.mxu0 (%p472_p8), %v1029_v6 }
 0x2d6   : >> { %1003 = vmatprep.mubr.f32.mxu1 %v901_v50  ;;  %1068 = vperm.xlu0 (%p472_p8), %2571, %v1046_v4  }
 0x2d7   : >> { %1004 = vmatmul.mubr.f32.gmra.mrb[6].mxu1 %v900_v51  ;;  %1078 = vperm.xlu1 (%p472_p8), %2572, %v1048_v11   ;;  %v2868_v51 = vmov (%p472_p8), 2  }
 0x2da   : > { %1083 = vperm.xlu0 (%p472_p8), %2571, %v1049_v12  }
 0x2db   : > { %1088 = vperm.xlu1 (%p472_p8), %2572, %v1050_v18  }
 0x2de   : > { %1093 = vperm.xlu0 (%p472_p8), %2571, %v1051_v19  }
 0x2df   : > { %1098 = vperm.xlu1 (%p472_p8), %2572, %v1052_v23  }
 0x2e2   : > { %1103 = vperm.xlu0 (%p472_p8), %2571, %v1053_v24  }
 0x2e3   : > { %1108 = vperm.xlu1 (%p472_p8), %2572, %v1054_v26  }
 0x2e6   : > { %1113 = vperm.xlu0 (%p472_p8), %2571, %v1055_v27  }
 0x2e7   : > { %1118 = vperm.xlu1 (%p472_p8), %2572, %v1056_v28  }
 0x2ea   : > { %1123 = vperm.xlu0 (%p472_p8), %2571, %v1057_v30   ;;  %v2869_v30 = vmov (%p472_p8), 3  }
 0x2eb   : > { %1128 = vperm.xlu1 (%p472_p8), %2572, %v1058_v32  }
 0x2ee   : > { %1133 = vperm.xlu0 (%p472_p8), %2571, %v1059_v34  }
 0x2ef   : > { %1138 = vperm.xlu1 (%p472_p8), %2572, %v1060_v36  }
 0x2f2   : > { %2574 = vset.pattern.permute.xlu0 (%p472_p8), %v2868_v51 }
 0x3a6   : >> { %v2149_v53 = vpop.f32.mrb[4].mxu1 }
 0x3a7   : >> { %v2150_v55 = vpop.f32.mrb[5].mxu1 }
 0x3a8   : >> { %v2151_v54 = vadd.f32 %v2150_v55, %v2149_v53  ;;  %474 = sbr.rel (!%p472_p8) target bundleno = 145 (0x91), region = 126  ;;  %v1064_v53 = vpop.permute.xlu0 (%p472_p8), %1063 }
 0x3aa   : >> { %1011 = vst.msk [vmem:[%s1009_s16] sm:$0xff] %vm1010_vm4, %v2151_v54  ;;  %v2152_v62 = vpop.f32.mrb[6].mxu1  ;;  %v1074_v54 = vpop.permute.xlu1 (%p472_p8), %1073 }
 0x3ab   : >> { %v2153_v56 = vpop.f32.mrb[7].mxu1 }
 0x3ac   : >> { %v2154_v57 = vadd.f32 %v2153_v56, %v2152_v62  ;;  %v1069_v55 = vpop.permute.xlu0 (%p472_p8), %1068 }
 0x3ae   : >> { %1012 = vst.msk [vmem:[%s1009_s16 + $0x8] sm:$0xff] %vm1010_vm4, %v2154_v57  ;;  %s1913_s16 = scalar_lea.sflag (%p472_p8), [#allocation5], %s412_s25 }
 0x3b0   : > { %v1084_v56 = vpop.permute.xlu0 %1083 }
 0x3b5   : > { %v1013_v15 = vld [vmem:[#allocation2] sm:$0xff]  ;;  %v1014_v60 = vld [vmem:[#allocation2 + $0x8] sm:$0xff]  ;;  %v1015_v49 = vld [vmem:[#allocation2 + $0x10] sm:$0xff] }
 0x3b6   : > { %v2359_v52 = vpack.c.bf16 %v1014_v60, %v1013_v15  ;;  %v1016_v59 = vld [vmem:[#allocation2 + $0x18] sm:$0xff]  ;;  %v1017_v63 = vld [vmem:[#allocation2 + $0x20] sm:$0xff]  ;;  %v1018_v48 = vld [vmem:[#allocation2 + $0x28] sm:$0xff] }
 0x3b7   : > { %v2363_v61 = vpack.c.bf16 %v1016_v59, %v1015_v49  ;;  %v2367_v10 = vpack.c.bf16 %v1018_v48, %v1017_v63  ;;  %v1019_v14 = vld [vmem:[#allocation2 + $0x30] sm:$0xff]  ;;  %v1020_v50 = vld [vmem:[#allocation2 + $0x38] sm:$0xff]  ;;  %v1021_v1 = vld [vmem:[#allocation2 + $0x40] sm:$0xff]  ;;  %v1079_v48 = vpop.permute.xlu1 %1078 }
 0x3b8   : > { %2360 = vmatprep.subr.bf16.mxu0 %v2359_v52  ;;  %v2371_v0 = vpack.c.bf16 %v1020_v50, %v1019_v14  ;;  %v1022_v2 = vld [vmem:[#allocation2 + $0x48] sm:$0xff]  ;;  %v1023_v8 = vld [vmem:[#allocation2 + $0x50] sm:$0xff]  ;;  %v1024_v9 = vld [vmem:[#allocation2 + $0x58] sm:$0xff] }
 0x3b9   : > { %2362 = vmatpush3.bf16.msra.mxu0 %v2359_v52  ;;  %v2375_v7 = vpack.c.bf16 %v1022_v2, %v1021_v1  ;;  %v2379_v13 = vpack.c.bf16 %v1024_v9, %v1023_v8  ;;  %v1025_v16 = vld [vmem:[#allocation2 + $0x60] sm:$0xff]  ;;  %v1026_v17 = vld [vmem:[#allocation2 + $0x68] sm:$0xff]  ;;  %v1027_v21 = vld [vmem:[#allocation2 + $0x70] sm:$0xff] }
 0x3ba   : > { %2364 = vmatprep.subr.bf16.mxu0 %v2363_v61  ;;  %v2383_v20 = vpack.c.bf16 %v1026_v17, %v1025_v16  ;;  %v1028_v22 = vld [vmem:[#allocation2 + $0x78] sm:$0xff] }
 0x3bb   : > { %v2387_v25 = vpack.c.bf16 %v1028_v22, %v1027_v21  ;;  %v1089_v2 = vpop.permute.xlu1 %1088 }
 0x3bd   : > { %2366 = vmatpush3.bf16.msra.mxu0 %v2363_v61 }
 0x3be   : > { %2368 = vmatprep.subr.bf16.mxu0 %v2367_v10 }
 0x3c1   : > { %2370 = vmatpush3.bf16.msra.mxu0 %v2367_v10  ;;  %v3501_v10 = vpop.permute.xlu0 %1093 }
 0x3c2   : > { %2372 = vmatprep.subr.bf16.mxu0 %v2371_v0 }
 0x3c5   : > { %2374 = vmatpush3.bf16.msra.mxu0 %v2371_v0  ;;  %v3507_v4 = vpop.permute.xlu0 %1103 }
 0x3c6   : > { %2376 = vmatprep.subr.bf16.mxu0 %v2375_v7 }
 0x3c9   : > { %2378 = vmatpush3.bf16.msra.mxu0 %v2375_v7  ;;  %v3520_v19 = vpop.permute.xlu0 %1113 }
 0x3ca   : > { %2380 = vmatprep.subr.bf16.mxu0 %v2379_v13 }
 0x3cd   : > { %2382 = vmatpush3.bf16.msra.mxu0 %v2379_v13 }
 0x3ce   : > { %2384 = vmatprep.subr.bf16.mxu0 %v2383_v20 }
 0x3d1   : > { %2386 = vmatpush3.bf16.msra.mxu0 %v2383_v20 }
 0x3d2   : > { %2388 = vmatprep.subr.bf16.mxu0 %v2387_v25 }
 0x3d5   : > { %2390 = vmatpush3.bf16.msra.mxu0 %v2387_v25 }
 0x3d8   : > { %2237 = vmatmul.mubr.f32.vlgmr.msra.gmra.mrb[0].mxu0 %v1030_v29  ;;  %v1124_v29 = vpop.permute.xlu0 %1123 }
 0x3d9   : > { %2239 = vmatprep.mubr.f32.mxu0 %v1031_v31  ;;  %v2870_v31 = vmov 1  }
 0x3dc   : > { %2240 = vmatmul.mubr.f32.gmra.mrb[2].mxu0 %v1032_v33 }
 0x3dd   : > { %2242 = vmatprep.mubr.f32.mxu0 %v1033_v35 }
 0x3e0   : > { %2243 = vmatmul.mubr.f32.gmra.mrb[4].mxu0 %v1034_v37 }
 0x3e1   : > { %2245 = vmatprep.mubr.f32.mxu0 %v1035_v38 }
 0x3e4   : > { %2246 = vmatmul.mubr.f32.gmra.mrb[6].mxu0 %v1036_v39 }
 0x3e5   : > { %2248 = vmatprep.mubr.f32.mxu0 %v1037_v40 }
 0x3e8   : > { %2249 = vmatmul.mubr.f32.gmra.mrb[8].mxu0 %v1038_v41  ;;  %v1099_v41 = vpop.permute.xlu1 %1098 }
 0x3e9   : > { %2251 = vmatprep.mubr.f32.mxu0 %v1039_v42 }
 0x3ec   : > { %2252 = vmatmul.mubr.f32.gmra.mrb[10].mxu0 %v1040_v43 }
 0x3ed   : > { %2254 = vmatprep.mubr.f32.mxu0 %v1041_v44 }
 0x3f0   : > { %2255 = vmatmul.mubr.f32.gmra.mrb[12].mxu0 %v1042_v45 }
 0x3f1   : > { %2257 = vmatprep.mubr.f32.mxu0 %v1043_v46 }
 0x3f4   : > { %2258 = vmatmul.mubr.f32.gmra.mrb[14].mxu0 %v1044_v47 }
 0x4ab   : > { %v2238_v62 = vpop.f32.mrb[0].mxu0 }
 0x4ac   : > { %v1213_v57 = vadd.f32 %v2238_v62, %v1069_v55  ;;  %v1207_v15 = vpop.f32.mrb[1].mxu0 }
 0x4ad   : > { %v1208_v60 = vadd.f32 %v1207_v15, %v1064_v53  ;;  %v2871_v15 = vmov 0.0|0.0  }
 0x4ae   : > { %v1303_v49 = vmin.f32 %v1213_v57, 0.0  ;;  %vm1287_vm5 = vcmp.gt.f32.partialorder %v1213_v57, 0.0  ;;  %2391 = vmatprep.subr.bf16.mxu1 %v2871_v15 }
 0x4af   : > { %v2241_v52 = vpop.f32.mrb[2].mxu0  ;;  %v1302_v61 = vmin.f32 %v1208_v60, 0.0  ;;  %vm1286_vm6 = vcmp.gt.f32.partialorder %v1208_v60, 0.0 }
 0x4b0   : > { %v1320_v59 = vmul.f32 1.442695, %v1303_v49  ;;  %v1217_v63 = vpop.f32.mrb[3].mxu0  ;;  %v3505_v1 = vadd.f32 %v2241_v52, %v1079_v48 }
 0x4b1   : > { %v1318_v14 = vmul.f32 1.442695, %v1302_v61  ;;  %v3503_v0 = vadd.f32 %v1217_v63, %v1074_v54 }
 0x4b2   : > { %2631 = vpow2.f32 %v1320_v59  ;;  %v1305_v9 = vmin.f32 %v3505_v1, 0.0  ;;  %vm1289_vm8 = vcmp.gt.f32.partialorder %v3505_v1, 0.0 }
 0x4b3   : > { %v2244_v6 = vpop.f32.mrb[4].mxu0  ;;  %2633 = vpow2.f32 %v1318_v14  ;;  %v1304_v7 = vmin.f32 %v3503_v0, 0.0  ;;  %vm1288_vm7 = vcmp.gt.f32.partialorder %v3503_v0, 0.0 }
 0x4b4   : > { %v1227_v50 = vpop.f32.mrb[5].mxu0  ;;  %v3512_v8 = vadd.f32 %v2244_v6, %v1089_v2  ;;  %v1324_v20 = vmul.f32 1.442695, %v1305_v9 }
 0x4b5   : > { %v1322_v16 = vmul.f32 1.442695, %v1304_v7  ;;  %v3522_v21 = vadd.f32 %v1227_v50, %v1084_v56 }
 0x4b6   : > { %v1307_v17 = vmin.f32 %v3512_v8, 0.0  ;;  %vm1291_vm9 = vcmp.gt.f32.partialorder %v3512_v8, 0.0 }
 0x4b7   : > { %v2247_v3 = vpop.f32.mrb[6].mxu0  ;;  %2635 = vpow2.f32 %v1322_v16  ;;  %v1306_v27 = vmin.f32 %v3522_v21, 0.0  ;;  %vm1290_vm10 = vcmp.gt.f32.partialorder %v3522_v21, 0.0 }
 0x4b8   : > { %v3509_v5 = vpop.f32.mrb[7].mxu0  ;;  %v1328_v25 = vmul.f32 1.442695, %v1307_v17  ;;  %2637 = vpow2.f32 %v1324_v20  ;;  %v1243_v42 = vadd.f32 %v2247_v3, %v1099_v41 }
 0x4b9   : > { %v1326_v35 = vmul.f32 1.442695, %v1306_v27  ;;  %v1238_v7 = vadd.f32 %v3509_v5, %v3501_v10 }
 0x4ba   : > { %2639 = vpow2.f32 %v1328_v25  ;;  %v1309_v46 = vmin.f32 %v1243_v42, 0.0  ;;  %vm1293_vm11 = vcmp.gt.f32.partialorder %v1243_v42, 0.0 }
 0x4bb   : > { %v3515_v11 = vpop.f32.mrb[8].mxu0  ;;  %2641 = vpow2.f32 %v1326_v35  ;;  %vm1292_vm15 = vcmp.gt.f32.partialorder %v1238_v7, 0.0 }
 0x4bc   : > { %v2632_v12 = vpop.eup %2631  ;;  %v3517_v13 = vpop.f32.mrb[9].mxu0  ;;  %v1332_v62 = vmul.f32 1.442695, %v1309_v46 }
 0x4bd   : > { %v2095_v18 = vadd.f32 -1.0, %v2632_v12  ;;  %v2634_v26 = vpop.eup %2633  ;;  %v1248_v52 = vadd.f32 %v3517_v13, %v3507_v4  ;;  %v1308_v13 = vmin.f32 %v1238_v7, 0.0 }
 0x4be   : > { %v2094_v34 = vadd.f32 -1.0, %v2634_v26  ;;  %2643 = vpow2.f32 %v1332_v62 }
 0x4bf   : > { %v3524_v22 = vpop.f32.mrb[10].mxu0  ;;  %v1367_v23 = vsel %vm1287_vm5, %v1213_v57, %v2095_v18  ;;  %v1310_v61 = vmin.f32 %v1248_v52, 0.0  ;;  %vm1294_vm12 = vcmp.gt.f32.partialorder %v1248_v52, 0.0  ;;  %v1330_v5 = vmul.f32 1.442695, %v1308_v13 }
 0x4c0   : > { %1629 = vperm.xlu0 %2574, %v1367_v23   ;;  %1405 = vperm.xlu1 %2572, %v1367_v23   ;;  %v3526_v24 = vpop.f32.mrb[11].mxu0  ;;  %v1366_v38 = vsel %vm1286_vm6, %v1208_v60, %v2094_v34  ;;  %v3555_v60 = vpop.permute.xlu1 %1108  ;;  %vm2872_vm5 = vmmov 0  }
 0x4c1   : > { %v2636_v39 = vpop.eup %2635  ;;  %v1334_v6 = vmul.f32 1.442695, %v1310_v61  ;;  %v1258_v50 = vadd.f32 %v3526_v24, %v3520_v19  ;;  %v1134_v24 = vpop.permute.xlu0 %1133  ;;  %v1253_v27 = vadd.f32 %v3515_v11, %v3555_v60 }
 0x4c2   : > { %v2638_v40 = vpop.eup %2637  ;;  %v2096_v43 = vadd.f32 -1.0, %v2636_v39 }
 0x4c3   : > { %v3529_v28 = vpop.f32.mrb[12].mxu0  ;;  %v2097_v45 = vadd.f32 -1.0, %v2638_v40  ;;  %2645 = vpow2.f32 %v1334_v6  ;;  %v1312_v2 = vmin.f32 %v1258_v50, 0.0  ;;  %vm1296_vm14 = vcmp.gt.f32.partialorder %v1258_v50, 0.0  ;;  %v1382_v6 = vld [vmem:[#allocation9] sm:$0xff] }
 0x4c4   : > { %2575 = vset.pattern.permute.xlu0 %v2869_v30  ;;  %2573 = vset.pattern.permute.xlu1 %v2870_v31  ;;  %v1267_v32 = vpop.f32.mrb[13].mxu0  ;;  %v2640_v44 = vpop.eup %2639  ;;  %v1368_v47 = vsel %vm1288_vm7, %v3503_v0, %v2096_v43  ;;  %vm1295_vm2 = vcmp.gt.f32.partialorder %v1253_v27, 0.0 }
 0x4c5   : > { %v3533_v33 = vadd.f32 %v1267_v32, %v1124_v29  ;;  %1742 = vperm.xlu0 %2575, %v1367_v23   ;;  %1516 = vperm.xlu1 %2573, %v1367_v23   ;;  %v2099_v53 = vadd.f32 -1.0, %v2640_v44  ;;  %v1369_v55 = vsel %vm1289_vm8, %v3505_v1, %v2097_v45  ;;  %v2642_v54 = vpop.eup %2641  ;;  %v1119_v59 = vpop.permute.xlu1 %1118  ;;  %v1338_v4 = vmul.f32 1.442695, %v1312_v2 }
 0x4c6   : > { %v2098_v57 = vadd.f32 -1.0, %v2642_v54  ;;  %v1263_v63 = vadd.f32 %v3524_v22, %v1119_v59  ;;  %v1311_v32 = vmin.f32 %v1253_v27, 0.0 }
 0x4c7   : > { %v3535_v36 = vpop.f32.mrb[14].mxu0  ;;  %v3550_v56 = vsel %vm1291_vm9, %v3512_v8, %v2099_v53  ;;  %v1314_v54 = vmin.f32 %v3533_v33, 0.0  ;;  %vm1298_vm3 = vcmp.gt.f32.partialorder %v3533_v33, 0.0 }
 0x4c8   : > { %v3537_v37 = vpop.f32.mrb[15].mxu0  ;;  %v3560_v49 = vsel %vm1290_vm10, %v3522_v21, %v2098_v57  ;;  %v2644_v48 = vpop.eup %2643  ;;  %v1313_v14 = vmin.f32 %v1263_v63, 0.0  ;;  %vm1297_vm13 = vcmp.gt.f32.partialorder %v1263_v63, 0.0  ;;  %v1496_v57 = vld [vmem:[#allocation9 + $0x88] sm:$0xff] }
 0x4c9   : > { %2576 = vset.pattern.permute.xlu0 %v2867_v58  ;;  %2578 = vset.pattern.permute.xlu1 %v2868_v51  ;;  %v2101_v0 = vadd.f32 -1.0, %v2644_v48  ;;  %v1129_v9 = vpop.permute.xlu1 %1128  ;;  %v1278_v26 = vadd.f32 %v3537_v37, %v1134_v24  ;;  %v1342_v60 = vmul.f32 1.442695, %v1314_v54  ;;  %v1609_v48 = vld [vmem:[#allocation9 + $0x108] sm:$0xff] }
 0x4ca   : > { %1625 = vperm.xlu1 %2578, %v1366_v38   ;;  %1400 = vperm.xlu0 %2576, %v1366_v38   ;;  %v1340_v1 = vmul.f32 1.442695, %v1313_v14  ;;  %v1273_v12 = vadd.f32 %v3529_v28, %v1129_v9  ;;  %v1495_v14 = vld [vmem:[#allocation9 + $0x80] sm:$0xff] }
 0x4cb   : > { %v1373_v3 = vsel %vm1293_vm11, %v1243_v42, %v2101_v0  ;;  %v1316_v29 = vmin.f32 %v1278_v26, 0.0  ;;  %vm1300_vm1 = vcmp.gt.f32.partialorder %v1278_v26, 0.0  ;;  %v1608_v0 = vld [vmem:[#allocation9 + $0x100] sm:$0xff] }
 0x4cc   : > { %2647 = vpow2.f32 %v1340_v1  ;;  %v1315_v10 = vmin.f32 %v1273_v12, 0.0  ;;  %vm1299_vm0 = vcmp.gt.f32.partialorder %v1273_v12, 0.0  ;;  %v1721_v9 = vld [vmem:[#allocation9 + $0x180] sm:$0xff] }
 0x4cd   : > { %2649 = vpow2.f32 %v1338_v4  ;;  %v2646_v8 = vpop.eup %2645  ;;  %v1346_v37 = vmul.f32 1.442695, %v1316_v29 }
 0x4ce   : > { %2579 = vset.pattern.permute.xlu1 %v2869_v30  ;;  %2577 = vset.pattern.permute.xlu0 %v2870_v31  ;;  %v2102_v16 = vadd.f32 -1.0, %v2646_v8  ;;  %v1344_v21 = vmul.f32 1.442695, %v1315_v10  ;;  %2651 = vpow2.f32 %v1330_v5  ;;  %v1722_v8 = vld [vmem:[#allocation9 + $0x188] sm:$0xff] }
 0x4cf   : > { %1738 = vperm.xlu1 %2579, %v1366_v38   ;;  %1512 = vperm.xlu0 %2577, %v1366_v38   ;;  %v1336_v38 = vmul.f32 1.442695, %v1311_v32 }
 0x4d0   : > { %v3586_v18 = vsel %vm1294_vm12, %v1248_v52, %v2102_v16  ;;  %2653 = vpow2.f32 %v1344_v21 }
 0x4d1   : > { %2655 = vpow2.f32 %v1346_v37 }
 0x4d2   : > { %2657 = vpow2.f32 %v1336_v38  ;;  %v1497_v38 = vld [vmem:[#allocation9 + $0x90] sm:$0xff] }
 0x4d3   : > { %2580 = vset.pattern.permute.xlu1 %v2867_v58  ;;  %1520 = vperm.xlu0 %2577, %v1368_v47   ;;  %2659 = vpow2.f32 %v1342_v60 }
 0x4d4   : > { %1415 = vperm.xlu1 %2580, %v1369_v55  }
 0x4d6   : > { %v2648_v17 = vpop.eup %2647 }
 0x4d7   : > { %1532 = vperm.xlu0 %2577, %v3550_v56   ;;  %v2105_v19 = vadd.f32 -1.0, %v2648_v17  ;;  %v2650_v20 = vpop.eup %2649 }
 0x4d8   : > { %2581 = vset.pattern.permute.xlu1 %v2870_v31  ;;  %v2104_v23 = vadd.f32 -1.0, %v2650_v20  ;;  %v2652_v28 = vpop.eup %2651 }
 0x4d9   : > { %1524 = vperm.xlu1 %2581, %v1369_v55   ;;  %v3591_v22 = vsel %vm1297_vm13, %v1263_v63, %v2105_v19  ;;  %v2100_v35 = vadd.f32 -1.0, %v2652_v28 }
 0x4da   : > { %v3597_v25 = vsel %vm1296_vm14, %v1258_v50, %v2104_v23  ;;  %v2654_v34 = vpop.eup %2653 }
 0x4db   : > { %2590 = vset.pattern.permute.xlu0 %v2867_v58  ;;  %v2107_v11 = vadd.f32 -1.0, %v2654_v34  ;;  %v1372_v39 = vsel %vm1292_vm15, %v1238_v7, %v2100_v35  ;;  %v2656_v41 = vpop.eup %2655  ;;  %v1498_v34 = vld [vmem:[#allocation9 + $0x98] sm:$0xff]  ;;  %v1384_v35 = vld [vmem:[#allocation9 + $0x10] sm:$0xff] }
 0x4dc   : > { %1420 = vperm.xlu0 %2590, %v3560_v49   ;;  %v2658_v42 = vpop.eup %2657  ;;  %v2108_v43 = vadd.f32 -1.0, %v2656_v41  ;;  %v1610_v41 = vld [vmem:[#allocation9 + $0x110] sm:$0xff] }
 0x4dd   : > { %2582 = vset.pattern.permute.xlu1 %v2868_v51  ;;  %v3611_v40 = vsel %vm1299_vm0, %v1273_v12, %v2107_v11  ;;  %v2103_v44 = vadd.f32 -1.0, %v2658_v42  ;;  %v2660_v23 = vpop.eup %2659 }
 0x4de   : > { %1637 = vperm.xlu1 %2582, %v1369_v55   ;;  %v3622_v45 = vsel %vm1300_vm1, %v1278_v26, %v2108_v43 }
 0x4df   : > { %v1375_v46 = vsel %vm1295_vm2, %v1253_v27, %v2103_v44  ;;  %v1724_v44 = vld [vmem:[#allocation9 + $0x198] sm:$0xff] }
 0x4e0   : > { %2592 = vset.pattern.permute.xlu0 %v2868_v51 }
 0x4e1   : > { %1641 = vperm.xlu0 %2592, %v3560_v49  }
 0x4e2   : > { %2583 = vset.pattern.permute.xlu1 %v2869_v30 }
 0x4e3   : > { %1750 = vperm.xlu1 %2583, %v1369_v55  }
 0x4e5   : > { %2593 = vset.pattern.permute.xlu0 %v2869_v30 }
 0x4e6   : > { %1754 = vperm.xlu0 %2593, %v3560_v49  }
 0x4e7   : > { %2584 = vset.pattern.permute.xlu1 %v2867_v58 }
 0x4e8   : > { %1410 = vperm.xlu1 %2584, %v1368_v47  }
 0x4ea   : > { %2594 = vset.pattern.permute.xlu0 %v2867_v58 }
 0x4eb   : > { %1435 = vperm.xlu0 %2594, %v1373_v3  }
 0x4ec   : > { %2585 = vset.pattern.permute.xlu1 %v2868_v51 }
 0x4ed   : > { %1633 = vperm.xlu1 %2585, %v1368_v47  }
 0x4ef   : > { %2595 = vset.pattern.permute.xlu0 %v2868_v51 }
 0x4f0   : > { %1653 = vperm.xlu0 %2595, %v1373_v3  }
 0x4f1   : > { %2586 = vset.pattern.permute.xlu1 %v2869_v30 }
 0x4f2   : > { %1746 = vperm.xlu1 %2586, %v1368_v47   ;;  %v1139_v47 = vpop.permute.xlu1 %1138 }
 0x4f3   : > { %v1283_v19 = vadd.f32 %v3535_v36, %v1139_v47 }
 0x4f4   : > { %2596 = vset.pattern.permute.xlu0 %v2869_v30 }
 0x4f5   : > { %1766 = vperm.xlu0 %2596, %v1373_v3   ;;  %v1317_v26 = vmin.f32 %v1283_v19, 0.0  ;;  %vm1301_vm4 = vcmp.gt.f32.partialorder %v1283_v19, 0.0 }
 0x4f6   : > { %2587 = vset.pattern.permute.xlu1 %v2867_v58 }
 0x4f7   : > { %1425 = vperm.xlu1 %2587, %v3550_v56   ;;  %v1348_v28 = vmul.f32 1.442695, %v1317_v26 }
 0x4f9   : > { %2606 = vset.pattern.permute.xlu0 %v2870_v31  ;;  %2661 = vpow2.f32 %v1348_v28 }
 0x4fa   : > { %1544 = vperm.xlu0 %2606, %v3586_v18  }
 0x4fb   : > { %2588 = vset.pattern.permute.xlu1 %v2868_v51 }
 0x4fc   : > { %1645 = vperm.xlu1 %2588, %v3550_v56  }
 0x4fe   : > { %1556 = vperm.xlu0 %2606, %v3591_v22  }
 0x500   : > { %2589 = vset.pattern.permute.xlu1 %v2869_v30 }
 0x501   : > { %1758 = vperm.xlu1 %2589, %v3550_v56  }
 0x502   : > { %2612 = vset.pattern.permute.xlu0 %v2867_v58 }
 0x503   : > { %1450 = vperm.xlu0 %2612, %v3597_v25   ;;  %v2662_v37 = vpop.eup %2661 }
 0x505   : > { %2591 = vset.pattern.permute.xlu1 %v2870_v31 }
 0x506   : > { %1528 = vperm.xlu1 %2591, %v3560_v49   ;;  %v1383_v49 = vld [vmem:[#allocation9 + $0x8] sm:$0xff] }
 0x507   : > { %2614 = vset.pattern.permute.xlu0 %v2868_v51 }
 0x508   : > { %1665 = vperm.xlu0 %2614, %v3597_v25  }
 0x50a   : > { %1540 = vperm.xlu1 %2591, %v1373_v3  }
 0x50c   : > { %2615 = vset.pattern.permute.xlu0 %v2869_v30 }
 0x50d   : > { %1778 = vperm.xlu0 %2615, %v3597_v25  }
 0x50e   : > { %2597 = vset.pattern.permute.xlu1 %v2867_v58 }
 0x50f   : > { %1430 = vperm.xlu1 %2597, %v1372_v39  }
 0x511   : > { %2616 = vset.pattern.permute.xlu0 %v2867_v58 }
 0x512   : > { %1465 = vperm.xlu0 %2616, %v3611_v40  }
 0x513   : > { %2598 = vset.pattern.permute.xlu1 %v2870_v31 }
 0x514   : > { %1536 = vperm.xlu1 %2598, %v1372_v39  }
 0x516   : > { %2617 = vset.pattern.permute.xlu0 %v2868_v51 }
 0x517   : > { %1677 = vperm.xlu0 %2617, %v3611_v40  }
 0x518   : > { %2599 = vset.pattern.permute.xlu1 %v2868_v51 }
 0x519   : > { %1649 = vperm.xlu1 %2599, %v1372_v39  }
 0x51b   : > { %2618 = vset.pattern.permute.xlu0 %v2869_v30 }
 0x51c   : > { %1790 = vperm.xlu0 %2618, %v3611_v40  }
 0x51d   : > { %2600 = vset.pattern.permute.xlu1 %v2869_v30 }
 0x51e   : > { %1762 = vperm.xlu1 %2600, %v1372_v39   ;;  %v1385_v39 = vld [vmem:[#allocation9 + $0x18] sm:$0xff] }
 0x520   : > { %2627 = vset.pattern.permute.xlu0 %v2870_v31 }
 0x521   : > { %1568 = vperm.xlu0 %2627, %v3622_v45  }
 0x522   : > { %2601 = vset.pattern.permute.xlu1 %v2867_v58 }
 0x523   : > { %1445 = vperm.xlu1 %2601, %v1375_v46  }
 0x525   : > { %2629 = vset.pattern.permute.xlu0 %v2869_v30 }
 0x526   : > { %1794 = vperm.xlu0 %2629, %v3622_v45  }
 0x527   : > { %2602 = vset.pattern.permute.xlu1 %v2870_v31 }
 0x528   : > { %1548 = vperm.xlu1 %2602, %v1375_v46  }
 0x52c   : > { %2603 = vset.pattern.permute.xlu1 %v2868_v51 }
 0x52d   : > { %1661 = vperm.xlu1 %2603, %v1375_v46  }
 0x531   : > { %2604 = vset.pattern.permute.xlu1 %v2869_v30 }
 0x532   : > { %1774 = vperm.xlu1 %2604, %v1375_v46   ;;  %v2109_v46 = vadd.f32 -1.0, %v2662_v37  ;;  %v2873_v37 = vmov 0.0  }
 0x533   : > { %2292 = vmatprep.mubr.msk.f32.mxu1 %vm2872_vm5, %v2873_v37 }
 0x536   : > { %2605 = vset.pattern.permute.xlu1 %v2867_v58 }
 0x537   : > { %1440 = vperm.xlu1 %2605, %v3586_v18  }
 0x53b   : > { %2607 = vset.pattern.permute.xlu1 %v2868_v51 }
 0x53c   : > { %1657 = vperm.xlu1 %2607, %v3586_v18  }
 0x53f   : > { %v1630_v53 = vpop.permute.xlu0 %1629  ;;  %v1406_v55 = vpop.permute.xlu1 %1405 }
 0x540   : > { %2608 = vset.pattern.permute.xlu1 %v2869_v30  ;;  %v1479_v63 = vmul.f32 %v1406_v55, %v1383_v49  ;;  %v1689_v3 = vmul.f32 %v1630_v53, %v1609_v48 }
 0x541   : > { %1770 = vperm.xlu1 %2608, %v3586_v18  }
 0x544   : > { %v1743_v62 = vpop.permute.xlu0 %1742  ;;  %v1517_v56 = vpop.permute.xlu1 %1516 }
 0x545   : > { %2609 = vset.pattern.permute.xlu1 %v2867_v58  ;;  %v1576_v52 = vmul.f32 %v1517_v56, %v1496_v57  ;;  %v1802_v17 = vmul.f32 %v1743_v62, %v1722_v8  ;;  %v1723_v62 = vld [vmem:[#allocation9 + $0x190] sm:$0xff]  ;;  %v1500_v8 = vld [vmem:[#allocation9 + $0xa8] sm:$0xff] }
 0x546   : > { %1455 = vperm.xlu1 %2609, %v3591_v22  }
 0x547   : > { %v1592_v50 = vadd.f32 %v1576_v52, %v1479_v63  ;;  %v1381_v52 = vsel %vm1301_vm4, %v1283_v19, %v2109_v46 }
 0x549   : > { %v1626_v59 = vpop.permute.xlu1 %1625  ;;  %v1401_v61 = vpop.permute.xlu0 %1400  ;;  %v1705_v12 = vadd.f32 %v1689_v3, %v1592_v50 }
 0x54a   : > { %2610 = vset.pattern.permute.xlu1 %v2868_v51  ;;  %v1478_v4 = vmul.f32 %v1401_v61, %v1382_v6  ;;  %v1688_v13 = vmul.f32 %v1626_v59, %v1608_v0 }
 0x54b   : > { %1669 = vperm.xlu1 %2610, %v3591_v22   ;;  %v1818_v21 = vadd.f32 %v1802_v17, %v1705_v12  ;;  %v1499_v12 = vld [vmem:[#allocation9 + $0xa0] sm:$0xff]  ;;  %v1726_v17 = vld [vmem:[#allocation9 + $0x1a8] sm:$0xff] }
 0x54e   : > { %v1739_v1 = vpop.permute.xlu1 %1738  ;;  %v1513_v2 = vpop.permute.xlu0 %1512 }
 0x54f   : > { %v1575_v7 = vmul.f32 %v1513_v2, %v1495_v14  ;;  %2611 = vset.pattern.permute.xlu1 %v2869_v30  ;;  %v1801_v10 = vmul.f32 %v1739_v1, %v1721_v9  ;;  %v1613_v9 = vld [vmem:[#allocation9 + $0x128] sm:$0xff] }
 0x550   : > { %1782 = vperm.xlu1 %2611, %v3591_v22   ;;  %v2106_v22 = vadd.f32 -1.0, %v2660_v23 }
 0x551   : > { %v1591_v16 = vadd.f32 %v1575_v7, %v1478_v4  ;;  %v1387_v7 = vld [vmem:[#allocation9 + $0x28] sm:$0xff] }
 0x552   : > { %v1521_v11 = vpop.permute.xlu0 %1520 }
 0x553   : > { %v1704_v5 = vadd.f32 %v1688_v13, %v1591_v16  ;;  %v1416_v18 = vpop.permute.xlu1 %1415  ;;  %v1577_v47 = vmul.f32 %v1521_v11, %v1497_v38  ;;  %v1612_v16 = vld [vmem:[#allocation9 + $0x120] sm:$0xff]  ;;  %v1389_v38 = vld [vmem:[#allocation9 + $0x38] sm:$0xff] }
 0x554   : > { %2613 = vset.pattern.permute.xlu1 %v2870_v31  ;;  %v1481_v53 = vmul.f32 %v1416_v18, %v1385_v39 }
 0x555   : > { %1552 = vperm.xlu1 %2613, %v3597_v25   ;;  %v1817_v20 = vadd.f32 %v1801_v10, %v1704_v5  ;;  %v1378_v25 = vsel %vm1298_vm3, %v3533_v33, %v2106_v22 }
 0x556   : > { %v1533_v14 = vpop.permute.xlu0 %1532 }
 0x557   : > { %v2392_v24 = vpack.c.bf16 %v1818_v21, %v1817_v20  ;;  %v1580_v5 = vmul.f32 %v1533_v14, %v1500_v8  ;;  %v1503_v8 = vld [vmem:[#allocation9 + $0xc0] sm:$0xff] }
 0x558   : > { %v1525_v27 = vpop.permute.xlu1 %1524 }
 0x559   : > { %1564 = vperm.xlu1 %2613, %v3611_v40   ;;  %2393 = vmatpush3.bf16.msra.mxu1 %v2392_v24  ;;  %v1611_v40 = vld [vmem:[#allocation9 + $0x118] sm:$0xff]  ;;  %v1578_v42 = vmul.f32 %v1525_v27, %v1498_v34 }
 0x55a   : > { %2394 = vmatprep.subr.bf16.mxu1 %v2871_v15 }
 0x55b   : > { %v1594_v56 = vadd.f32 %v1578_v42, %v1481_v53  ;;  %v1421_v1 = vpop.permute.xlu0 %1420 }
 0x55d   : > { %2619 = vset.pattern.permute.xlu1 %v2867_v58  ;;  %v1638_v36 = vpop.permute.xlu1 %1637 }
 0x55e   : > { %1460 = vperm.xlu1 %2619, %v1378_v25   ;;  %v1691_v55 = vmul.f32 %v1638_v36, %v1611_v40 }
 0x560   : > { %v1707_v59 = vadd.f32 %v1691_v55, %v1594_v56  ;;  %v1642_v4 = vpop.permute.xlu0 %1641 }
 0x561   : > { %v1692_v23 = vmul.f32 %v1642_v4, %v1612_v16  ;;  %v1504_v4 = vld [vmem:[#allocation9 + $0xc8] sm:$0xff] }
 0x562   : > { %2620 = vset.pattern.permute.xlu1 %v2870_v31  ;;  %v1751_v29 = vpop.permute.xlu1 %1750 }
 0x563   : > { %1560 = vperm.xlu1 %2620, %v1378_v25   ;;  %v1804_v57 = vmul.f32 %v1751_v29, %v1724_v44 }
 0x565   : > { %v1820_v48 = vadd.f32 %v1804_v57, %v1707_v59  ;;  %v1755_v21 = vpop.permute.xlu0 %1754  ;;  %v1727_v57 = vld [vmem:[#allocation9 + $0x1b0] sm:$0xff] }
 0x567   : > { %2621 = vset.pattern.permute.xlu1 %v2868_v51  ;;  %v1411_v32 = vpop.permute.xlu1 %1410 }
 0x568   : > { %1673 = vperm.xlu1 %2621, %v1378_v25   ;;  %v1480_v33 = vmul.f32 %v1411_v32, %v1384_v35 }
 0x56a   : > { %v1593_v60 = vadd.f32 %v1577_v47, %v1480_v33  ;;  %v1436_v35 = vpop.permute.xlu0 %1435  ;;  %v1388_v33 = vld [vmem:[#allocation9 + $0x30] sm:$0xff] }
 0x56b   : > { %v1485_v42 = vmul.f32 %v1436_v35, %v1389_v38 }
 0x56c   : > { %2622 = vset.pattern.permute.xlu1 %v2869_v30  ;;  %v1634_v43 = vpop.permute.xlu1 %1633 }
 0x56d   : > { %1786 = vperm.xlu1 %2622, %v1378_v25   ;;  %v1690_v54 = vmul.f32 %v1634_v43, %v1610_v41  ;;  %v1501_v41 = vld [vmem:[#allocation9 + $0xb0] sm:$0xff] }
 0x56e   : > { %v1614_v43 = vld [vmem:[#allocation9 + $0x130] sm:$0xff] }
 0x56f   : > { %v1706_v61 = vadd.f32 %v1690_v54, %v1593_v60  ;;  %v1654_v40 = vpop.permute.xlu0 %1653 }
 0x571   : > { %2623 = vset.pattern.permute.xlu1 %v2867_v58  ;;  %v1747_v49 = vpop.permute.xlu1 %1746 }
 0x572   : > { %v1803_v63 = vmul.f32 %v1747_v49, %v1723_v62  ;;  %1475 = vperm.xlu1 %2623, %v1381_v52   ;;  %v1728_v62 = vld [vmem:[#allocation9 + $0x1b8] sm:$0xff] }
 0x574   : > { %v1819_v6 = vadd.f32 %v1803_v63, %v1706_v61  ;;  %v1767_v56 = vpop.permute.xlu0 %1766 }
 0x575   : > { %v1808_v59 = vmul.f32 %v1767_v56, %v1728_v62 }
 0x576   : > { %2624 = vset.pattern.permute.xlu1 %v2870_v31  ;;  %v1426_v50 = vpop.permute.xlu1 %1425  ;;  %v2395_v0 = vpack.c.bf16 %v1820_v48, %v1819_v6  ;;  %v1386_v31 = vld [vmem:[#allocation9 + $0x20] sm:$0xff] }
 0x577   : > { %1572 = vperm.xlu1 %2624, %v1381_v52   ;;  %v1483_v13 = vmul.f32 %v1426_v50, %v1387_v7  ;;  %v1482_v18 = vmul.f32 %v1421_v1, %v1386_v31  ;;  %v1390_v7 = vld [vmem:[#allocation9 + $0x40] sm:$0xff] }
 0x578   : > { %2396 = vmatpush3.bf16.msra.mxu1 %v2395_v0 }
 0x579   : > { %2397 = vmatprep.subr.bf16.mxu1 %v2871_v15  ;;  %v1596_v24 = vadd.f32 %v1580_v5, %v1483_v13  ;;  %v1545_v31 = vpop.permute.xlu0 %1544  ;;  %v1616_v13 = vld [vmem:[#allocation9 + $0x140] sm:$0xff]  ;;  %v1730_v5 = vld [vmem:[#allocation9 + $0x1c8] sm:$0xff] }
 0x57b   : > { %2625 = vset.pattern.permute.xlu1 %v2868_v51  ;;  %v1646_v2 = vpop.permute.xlu1 %1645 }
 0x57c   : > { %1685 = vperm.xlu1 %2625, %v1381_v52   ;;  %v1693_v19 = vmul.f32 %v1646_v2, %v1613_v9  ;;  %v1391_v9 = vld [vmem:[#allocation9 + $0x48] sm:$0xff] }
 0x57e   : > { %v1709_v36 = vadd.f32 %v1693_v19, %v1596_v24 }
 0x580   : > { %2626 = vset.pattern.permute.xlu1 %v2867_v58  ;;  %v1759_v3 = vpop.permute.xlu1 %1758  ;;  %v1725_v58 = vld [vmem:[#allocation9 + $0x1a0] sm:$0xff] }
 0x581   : > { %1470 = vperm.xlu1 %2626, %v3622_v45   ;;  %v1806_v26 = vmul.f32 %v1759_v3, %v1726_v17  ;;  %v1805_v28 = vmul.f32 %v1755_v21, %v1725_v58  ;;  %v1729_v21 = vld [vmem:[#allocation9 + $0x1c0] sm:$0xff] }
 0x585   : > { %2628 = vset.pattern.permute.xlu1 %v2868_v51  ;;  %v1529_v10 = vpop.permute.xlu1 %1528  ;;  %v1822_v51 = vadd.f32 %v1806_v26, %v1709_v36 }
 0x586   : > { %v1579_v20 = vmul.f32 %v1529_v10, %v1499_v12  ;;  %1681 = vperm.xlu1 %2628, %v3622_v45   ;;  %v1502_v45 = vld [vmem:[#allocation9 + $0xb8] sm:$0xff]  ;;  %v1617_v12 = vld [vmem:[#allocation9 + $0x148] sm:$0xff] }
 0x588   : > { %v1595_v27 = vadd.f32 %v1579_v20, %v1482_v18  ;;  %v1583_v18 = vmul.f32 %v1545_v31, %v1503_v8  ;;  %v1507_v8 = vld [vmem:[#allocation9 + $0xe0] sm:$0xff] }
 0x589   : > { %v1541_v22 = vpop.permute.xlu1 %1540 }
 0x58a   : > { %v1708_v25 = vadd.f32 %v1692_v23, %v1595_v27  ;;  %2630 = vset.pattern.permute.xlu1 %v2869_v30  ;;  %v1582_v39 = vmul.f32 %v1541_v22, %v1502_v45  ;;  %v1615_v30 = vld [vmem:[#allocation9 + $0x138] sm:$0xff] }
 0x58b   : > { %1798 = vperm.xlu1 %2630, %v1381_v52   ;;  %v1695_v53 = vmul.f32 %v1654_v40, %v1615_v30  ;;  %v1392_v40 = vld [vmem:[#allocation9 + $0x50] sm:$0xff] }
 0x58c   : > { %v1821_v29 = vadd.f32 %v1805_v28, %v1708_v25  ;;  %v1598_v44 = vadd.f32 %v1582_v39, %v1485_v42  ;;  %v1506_v39 = vld [vmem:[#allocation9 + $0xd8] sm:$0xff]  ;;  %v1505_v42 = vld [vmem:[#allocation9 + $0xd0] sm:$0xff] }
 0x58e   : > { %v1431_v32 = vpop.permute.xlu1 %1430  ;;  %v2398_v34 = vpack.c.bf16 %v1822_v51, %v1821_v29  ;;  %v1711_v60 = vadd.f32 %v1695_v53, %v1598_v44  ;;  %v1557_v29 = vpop.permute.xlu0 %1556 }
 0x58f   : > { %v1484_v55 = vmul.f32 %v1431_v32, %v1388_v33  ;;  %v1618_v33 = vld [vmem:[#allocation9 + $0x150] sm:$0xff] }
 0x590   : > { %2399 = vmatpush3.bf16.msra.mxu1 %v2398_v34  ;;  %v1824_v6 = vadd.f32 %v1808_v59, %v1711_v60 }
 0x591   : > { %2400 = vmatprep.subr.bf16.mxu1 %v2871_v15 }
 0x592   : > { %v1451_v35 = vpop.permute.xlu0 %1450 }
 0x593   : > { %v1537_v11 = vpop.permute.xlu1 %1536 }
 0x594   : > { %v1581_v46 = vmul.f32 %v1537_v11, %v1501_v41  ;;  %v1393_v11 = vld [vmem:[#allocation9 + $0x58] sm:$0xff] }
 0x595   : > { %v1619_v41 = vld [vmem:[#allocation9 + $0x158] sm:$0xff] }
 0x596   : > { %v1597_v49 = vadd.f32 %v1581_v46, %v1484_v55  ;;  %v1666_v38 = vpop.permute.xlu0 %1665  ;;  %v1586_v46 = vmul.f32 %v1557_v29, %v1506_v39 }
 0x597   : > { %v1698_v56 = vmul.f32 %v1666_v38, %v1618_v33 }
 0x598   : > { %v1650_v47 = vpop.permute.xlu1 %1649 }
 0x599   : > { %v1694_v54 = vmul.f32 %v1650_v47, %v1614_v43  ;;  %v1732_v43 = vld [vmem:[#allocation9 + $0x1d8] sm:$0xff]  ;;  %v1488_v47 = vmul.f32 %v1451_v35, %v1392_v40  ;;  %v1396_v35 = vld [vmem:[#allocation9 + $0x70] sm:$0xff] }
 0x59a   : > { %v1779_v62 = vpop.permute.xlu0 %1778  ;;  %v1622_v40 = vld [vmem:[#allocation9 + $0x170] sm:$0xff] }
 0x59b   : > { %v1710_v61 = vadd.f32 %v1694_v54, %v1597_v49  ;;  %v1731_v54 = vld [vmem:[#allocation9 + $0x1d0] sm:$0xff] }
 0x59c   : > { %v1811_v59 = vmul.f32 %v1779_v62, %v1731_v54  ;;  %v1736_v54 = vld [vmem:[#allocation9 + $0x1f8] sm:$0xff] }
 0x59d   : > { %v1763_v52 = vpop.permute.xlu1 %1762 }
 0x59e   : > { %v1807_v63 = vmul.f32 %v1763_v52, %v1727_v57 }
 0x5a0   : > { %v1823_v48 = vadd.f32 %v1807_v63, %v1710_v61 }
 0x5a2   : > { %v1446_v14 = vpop.permute.xlu1 %1445  ;;  %v2401_v50 = vpack.c.bf16 %v1824_v6, %v1823_v48 }
 0x5a3   : > { %v1487_v19 = vmul.f32 %v1446_v14, %v1391_v9  ;;  %v1621_v9 = vld [vmem:[#allocation9 + $0x168] sm:$0xff] }
 0x5a4   : > { %2402 = vmatpush3.bf16.msra.mxu1 %v2401_v50 }
 0x5a5   : > { %2403 = vmatprep.subr.bf16.mxu1 %v2871_v15 }
 0x5a7   : > { %v1549_v0 = vpop.permute.xlu1 %1548 }
 0x5a8   : > { %v1584_v16 = vmul.f32 %v1549_v0, %v1504_v4  ;;  %v1466_v0 = vpop.permute.xlu0 %1465 }
 0x5aa   : > { %v1600_v23 = vadd.f32 %v1584_v16, %v1487_v19 }
 0x5ac   : > { %v1662_v1 = vpop.permute.xlu1 %1661 }
 0x5ad   : > { %v1697_v20 = vmul.f32 %v1662_v1, %v1617_v12  ;;  %v1508_v1 = vld [vmem:[#allocation9 + $0xe8] sm:$0xff]  ;;  %v1394_v12 = vld [vmem:[#allocation9 + $0x60] sm:$0xff] }
 0x5af   : > { %v1713_v22 = vadd.f32 %v1697_v20, %v1600_v23  ;;  %v1734_v20 = vld [vmem:[#allocation9 + $0x1e8] sm:$0xff] }
 0x5b1   : > { %v1775_v2 = vpop.permute.xlu1 %1774 }
 0x5b2   : > { %v1810_v24 = vmul.f32 %v1775_v2, %v1730_v5  ;;  %v1395_v2 = vld [vmem:[#allocation9 + $0x68] sm:$0xff] }
 0x5b3   : > { %v1491_v31 = vmul.f32 %v1466_v0, %v1395_v2 }
 0x5b4   : > { %v1826_v25 = vadd.f32 %v1810_v24, %v1713_v22 }
 0x5b6   : > { %v1441_v3 = vpop.permute.xlu1 %1440 }
 0x5b7   : > { %v1486_v17 = vmul.f32 %v1441_v3, %v1390_v7  ;;  %v1678_v7 = vpop.permute.xlu0 %1677 }
 0x5b8   : > { %v1701_v5 = vmul.f32 %v1678_v7, %v1621_v9 }
 0x5b9   : > { %v1599_v26 = vadd.f32 %v1583_v18, %v1486_v17 }
 0x5bb   : > { %v1658_v10 = vpop.permute.xlu1 %1657 }
 0x5bc   : > { %v1696_v58 = vmul.f32 %v1658_v10, %v1616_v13  ;;  %v1620_v13 = vld [vmem:[#allocation9 + $0x160] sm:$0xff] }
 0x5be   : > { %v1712_v28 = vadd.f32 %v1696_v58, %v1599_v26  ;;  %v1791_v58 = vpop.permute.xlu0 %1790 }
 0x5c0   : > { %v1771_v27 = vpop.permute.xlu1 %1770 }
 0x5c1   : > { %v1809_v36 = vmul.f32 %v1771_v27, %v1729_v21  ;;  %v1733_v21 = vld [vmem:[#allocation9 + $0x1e0] sm:$0xff]  ;;  %v1814_v27 = vmul.f32 %v1791_v58, %v1734_v20 }
 0x5c2   : > { %v1569_v38 = vpop.permute.xlu0 %1568 }
 0x5c3   : > { %v1825_v51 = vadd.f32 %v1809_v36, %v1712_v28 }
 0x5c5   : > { %v1456_v32 = vpop.permute.xlu1 %1455  ;;  %v2404_v34 = vpack.c.bf16 %v1826_v25, %v1825_v51 }
 0x5c6   : > { %v1489_v30 = vmul.f32 %v1456_v32, %v1393_v11  ;;  %v1510_v11 = vld [vmem:[#allocation9 + $0xf8] sm:$0xff] }
 0x5c7   : > { %2405 = vmatpush3.bf16.msra.mxu1 %v2404_v34 }
 0x5c8   : > { %2406 = vmatprep.subr.bf16.mxu1 %v2871_v15  ;;  %v1602_v57 = vadd.f32 %v1586_v46, %v1489_v30 }
 0x5ca   : > { %v1670_v45 = vpop.permute.xlu1 %1669 }
 0x5cb   : > { %v1699_v53 = vmul.f32 %v1670_v45, %v1619_v41  ;;  %v1397_v41 = vld [vmem:[#allocation9 + $0x78] sm:$0xff] }
 0x5cd   : > { %v1715_v61 = vadd.f32 %v1699_v53, %v1602_v57 }
 0x5cf   : > { %v1783_v37 = vpop.permute.xlu1 %1782 }
 0x5d0   : > { %v1812_v60 = vmul.f32 %v1783_v37, %v1732_v43  ;;  %v1509_v37 = vld [vmem:[#allocation9 + $0xf0] sm:$0xff] }
 0x5d1   : > { %v1589_v30 = vmul.f32 %v1569_v38, %v1509_v37 }
 0x5d2   : > { %v1828_v48 = vadd.f32 %v1812_v60, %v1715_v61 }
 0x5d4   : > { %v1553_v44 = vpop.permute.xlu1 %1552 }
 0x5d5   : > { %v1585_v55 = vmul.f32 %v1553_v44, %v1505_v42  ;;  %v1623_v42 = vld [vmem:[#allocation9 + $0x178] sm:$0xff] }
 0x5d7   : > { %v1601_v49 = vadd.f32 %v1585_v55, %v1488_v47  ;;  %v1735_v55 = vld [vmem:[#allocation9 + $0x1f0] sm:$0xff] }
 0x5d8   : > { %v1565_v52 = vpop.permute.xlu1 %1564 }
 0x5d9   : > { %v1714_v63 = vadd.f32 %v1698_v56, %v1601_v49  ;;  %v1588_v4 = vmul.f32 %v1565_v52, %v1508_v1 }
 0x5db   : > { %v1827_v6 = vadd.f32 %v1811_v59, %v1714_v63  ;;  %v1604_v16 = vadd.f32 %v1588_v4, %v1491_v31 }
 0x5dd   : > { %v1461_v14 = vpop.permute.xlu1 %1460  ;;  %v2407_v50 = vpack.c.bf16 %v1828_v48, %v1827_v6  ;;  %v1717_v23 = vadd.f32 %v1701_v5, %v1604_v16  ;;  %v1833_v48 = vld [vmem:[%s3735_s8] sm:$0xff] }
 0x5de   : > { %v1490_v18 = vmul.f32 %v1461_v14, %v1394_v12  ;;  %v2110_v6 = vld [vmem:[%s3736_s9] ss:$0 sm:$0xff] }
 0x5df   : > { %2408 = vmatpush3.bf16.msra.mxu1 %v2407_v50  ;;  %v1830_v25 = vadd.f32 %v1814_v27, %v1717_v23 }
 0x5e0   : > { %2409 = vmatprep.subr.bf16.mxu1 %v2871_v15 }
 0x5e2   : > { %v1561_v3 = vpop.permute.xlu1 %1560 }
 0x5e3   : > { %v1587_v17 = vmul.f32 %v1561_v3, %v1507_v8 }
 0x5e5   : > { %v1603_v24 = vadd.f32 %v1587_v17, %v1490_v18 }
 0x5e7   : > { %v1674_v10 = vpop.permute.xlu1 %1673 }
 0x5e8   : > { %v1700_v19 = vmul.f32 %v1674_v10, %v1620_v13 }
 0x5ea   : > { %v1716_v22 = vadd.f32 %v1700_v19, %v1603_v24 }
 0x5ec   : > { %v1787_v26 = vpop.permute.xlu1 %1786 }
 0x5ed   : > { %v1813_v28 = vmul.f32 %v1787_v26, %v1733_v21 }
 0x5ef   : > { %v1829_v36 = vadd.f32 %v1813_v28, %v1716_v22 }
 0x5f1   : > { %v1476_v51 = vpop.permute.xlu1 %1475  ;;  %v2410_v29 = vpack.c.bf16 %v1830_v25, %v1829_v36 }
 0x5f2   : > { %v1493_v46 = vmul.f32 %v1476_v51, %v1397_v41 }
 0x5f3   : > { %2411 = vmatpush3.bf16.msra.mxu1 %v2410_v29 }
 0x5f4   : > { %2412 = vmatprep.subr.bf16.mxu1 %v2871_v15  ;;  %v1795_v15 = vpop.permute.xlu0 %1794 }
 0x5f5   : > { %v1815_v60 = vmul.f32 %v1795_v15, %v1735_v55 }
 0x5f6   : > { %v1573_v32 = vpop.permute.xlu1 %1572 }
 0x5f7   : > { %v1590_v33 = vmul.f32 %v1573_v32, %v1510_v11 }
 0x5f9   : > { %v1606_v62 = vadd.f32 %v1590_v33, %v1493_v46 }
 0x5fb   : > { %v1686_v34 = vpop.permute.xlu1 %1685 }
 0x5fc   : > { %v1703_v47 = vmul.f32 %v1686_v34, %v1623_v42 }
 0x5fe   : > { %v1719_v49 = vadd.f32 %v1703_v47, %v1606_v62 }
 0x600   : > { %v1471_v45 = vpop.permute.xlu1 %1470 }
 0x601   : > { %v1492_v39 = vmul.f32 %v1471_v45, %v1396_v35 }
 0x603   : > { %v1605_v53 = vadd.f32 %v1589_v30, %v1492_v39 }
 0x605   : > { %v1682_v43 = vpop.permute.xlu1 %1681 }
 0x606   : > { %v1702_v44 = vmul.f32 %v1682_v43, %v1622_v40 }
 0x608   : > { %v1718_v56 = vadd.f32 %v1702_v44, %v1605_v53 }
 0x60a   : > { %v1799_v57 = vpop.permute.xlu1 %1798  ;;  %v1831_v59 = vadd.f32 %v1815_v60, %v1718_v56 }
 0x60b   : > { %v1816_v52 = vmul.f32 %v1799_v57, %v1736_v54 }
 0x60d   : > { %v1832_v61 = vadd.f32 %v1816_v52, %v1719_v49 }
 0x60f   : > { %v2413_v63 = vpack.c.bf16 %v1832_v61, %v1831_v59 }
 0x611   : > { %2414 = vmatpush3.bf16.msra.mxu1 %v2413_v63 }
 0x614   : > { %2293 = vmatmul.mubr.f32.vlgmr.msra.gmra.mrb[0].mxu1 %v1833_v48 }
 0x6e7   : > { %v1907_v14 = vpop.f32.mrb[0].mxu1 }
 0x6e8   : > { %v1908_v50 = vadd.f32 %v2110_v6, %v1907_v14  ;;  %v2294_v0 = vpop.f32.mrb[1].mxu1 }
 0x6ea   : > { %1911 = vst [vmem:[%s414_s24] sm:$0xff] %v1908_v50 }
 0x6eb   : > { %2788 = shalt.err (!%p2785_p10)
}
 0x6ec   : > { %s2789_s25 = scalar_lea.hbm %s3681_s20, 128  ;;  %s2793_s26 = scalar_lea.hbm %s3737_s10, 256 }
 0x6ed   : > { %p2790_p2 = scmp.ne.s32.totalorder %s3681_s20, %s2789_s25  ;;  %p2794_p12 = scmp.lt.u32.totalorder %s3681_s20, %s3737_s10 }
 0x6ee   : > { %p2795_p7 = scmp.lt.u32.totalorder %s2793_s26, %s2789_s25  ;;  %p2797_p11 = scmp.lt.u32.totalorder %s2789_s25, %s3681_s20 }
 0x6ef   : > { %p2791_p3 = pnand %p2790_p2, %p3769_p13 }
 0x6f0   : > { %p2796_p8 = por %p2795_p7, %p2794_p12 }
 0x6f1   : > { %p2792_p4 = pneg %p2791_p3 }
 0x6f2   : > { %p2798_p1 = por %p2797_p11, %p2796_p8 }
 0x6f4   : > { %p2799_p6 = pnand %p2798_p1, %p2792_p4 }
 0x6f6   : > { %2802 = shalt.err (!%p2799_p6)
}
 0x6f7   : > { %2431 = dma.vmem_to_hbm [thread:$0]  (%p3769_p13), %s3683_s15, 128, %s3681_s20, %s1913_s16  }
 0x6f8 PF: > { %s3770_s27 = sld [smem:[#allocation18_spill]]  ;;  %s3771_s12 = sld [smem:[#allocation16_spill]] }
 0x6f9   : > { %s3772_s13 = sld [smem:[#allocation21_spill]] }
 0x6fe   : > { %p2458_p9 = scmp.ge.s32.totalorder %s3770_s27, 2  ;;  %s1938_s18 = sand.u32 1, %s3771_s12  }
 0x6ff   : > { %p3773_p5 = scmp.ne.s32.totalorder %s3772_s13, 0  ;;  %s1939_s30 = scalar_lea.sflag [#allocation5], %s1938_s18 }
 0x701   : > { %p2447_p0 = pnand %p2458_p9, %p3773_p5 }
 0x703   : > { %2836 = dma.done.wait (!%p2447_p0), %s1939_s30, 128  }
 0x704   : > { %2838 = vsyncadd (!%p2447_p0), %s1939_s30, 4294967168  ;;  %s3774_s16 = sld [smem:[#allocation19_spill]]  ;;  %s3775_s17 = sld [smem:[#allocation17_spill]] }
 0x705   : > { %s3776_s15 = sld [smem:[#allocation20_spill]]  ;;  %s3777_s13 = smov %s2845_s14 }
 0x70a   : > { %p23_p10 = scmp.ge.s32.totalorder %s3774_s16, 4   ;;  %s3778_s14 = smov %s3775_s17 }
 0x70c   :  { %25 = sbr.rel (!%p23_p10) target bundleno = 6 (0x6), region = 137 }
 0x713   :  { %1944 = vsyncpa [#allocation4], 1 }
 0x714   :  { %1946 = vsyncpa [#allocation4 + $0x1], 1 }
 0x715   :  { %1947 = vsyncpa [#allocation7], 1 }
 0x716   :  { %1948 = vsyncpa [#allocation10], 1 }
 0x717   :  { %1949 = vsyncpa [#allocation5], 1 }
 0x718   :  { %1951 = vsyncpa [#allocation5 + $0x1], 1 }

</bundles_post_ra>
